<compile_context>
chip_gen: v5e
topology: v5e:2x2
jax: 0.10.0
libtpu: 0.0.40
codegen_flags: <defaults>
</compile_context>

<pallas_src>
import jax
import jax.numpy as jnp
from jax.experimental import pallas as pl

# ----------------------------- problem sizes ------------------------------
B = 2                 # batch
FRAME = 32            # spectrogram frame length (hop == frame -> plain reshape)
T = 16                # time frames
F = 16                # frequency bins
NSAMP = FRAME * T     # 512 audio samples per example
P = 4                 # patch size (stand-in for 16 in DeiT)
HP, WP = T // P, F // P
N = HP * WP           # 16 tokens (no CLS/dist tokens in AudioDeiTEmbeddings)
C = 32                # hidden size
NUM_HEADS = 2
HEAD_DIM = C // NUM_HEADS
MLP = 4 * C           # DeiT MLP ratio 4
NUM_LAYERS = 2
LN_EPS = 1e-12        # HF DeiT layer_norm_eps

ROWS = B * HP         # 8   rows of the "wide" layout
PF = P * F            # 64  spectral width per wide row
WIDE = WP * C         # 128 lane-dense output width
NTOK = B * N          # 32  tokens across the whole batch


# ------------------------------- kernel ------------------------------------
def _layernorm(x, w, b):
    mu = jnp.mean(x, axis=-1, keepdims=True)
    var = jnp.mean((x - mu) ** 2, axis=-1, keepdims=True)
    return (x - mu) * jax.lax.rsqrt(var + LN_EPS) * w + b


def fused_forward_kernel(frames_ref, dft_ref, wtok_ref, posbias_ref, mask_ref,
                         ln1w_ref, ln1b_ref, wqkv_ref, bqkv_ref, wo_ref, bo_ref,
                         ln2w_ref, ln2b_ref, w1_ref, b1_ref, w2_ref, b2_ref,
                         lnfw_ref, lnfb_ref, o_ref):
    # 1) spectrogram: framed DFT power.  One matmul against the block-diagonal
    #    cos|sin basis gives re/im for all P frames of every row at once.
    re_im = jnp.dot(frames_ref[...], dft_ref[...],
                    preferred_element_type=jnp.float32)          # [ROWS, 2*PF]
    re, im = re_im[:, :PF], re_im[:, PF:]
    pow_wide = re * re + im * im                                 # [ROWS, PF]

    # 2) patch embedding straight into the wp-major token layout, plus
    #    positional encoding + conv bias (dropout is identity at eval).
    blocks = [jnp.dot(pow_wide, wtok_ref[wp], preferred_element_type=jnp.float32)
              for wp in range(WP)]
    x = jnp.concatenate(blocks, axis=0) + posbias_ref[...]       # [NTOK, C]

    mask = mask_ref[...]                                         # [NTOK, NTOK]
    scale = 1.0 / (HEAD_DIM ** 0.5)

    # 3) DeiT encoder (pre-LN) — both layers statically unrolled, head_mask=None;
    #    x never leaves VMEM/vregs.
    for li in range(NUM_LAYERS):
        h = _layernorm(x, ln1w_ref[li], ln1b_ref[li])
        qkv = (jnp.dot(h, wqkv_ref[li], preferred_element_type=jnp.float32)
               + bqkv_ref[li])                                   # [NTOK, 3C]
        q, k, v = qkv[:, :C], qkv[:, C:2 * C], qkv[:, 2 * C:]
        wo = wo_ref[li]
        attn = jnp.zeros_like(x)
        for hd in range(NUM_HEADS):                              # static unroll
            sl = slice(hd * HEAD_DIM, (hd + 1) * HEAD_DIM)
            qh, kh, vh = q[:, sl], k[:, sl], v[:, sl]
            s = jax.lax.dot_general(qh, kh, (((1,), (1,)), ((), ())),
                                    preferred_element_type=jnp.float32)
            s = s * scale + mask                                 # cross-batch mask
            s = s - jnp.max(s, axis=-1, keepdims=True)
            p = jnp.exp(s)
            p = p * pl.reciprocal(jnp.sum(p, axis=-1, keepdims=True),
                                  approx=True)
            oh = jnp.dot(p, vh, preferred_element_type=jnp.float32)
            # fold the head concat into a row-split output projection
            attn = attn + jnp.dot(oh, wo[sl, :],
                                  preferred_element_type=jnp.float32)
        x = x + attn + bo_ref[li]                                # residual 1
        h2 = _layernorm(x, ln2w_ref[li], ln2b_ref[li])
        m = jnp.dot(h2, w1_ref[li], preferred_element_type=jnp.float32) + b1_ref[li]
        # TODO(synk): HF DeiT uses exact erf GELU; tanh approximation used here.
        m = jax.nn.gelu(m, approximate=True)
        x = x + jnp.dot(m, w2_ref[li], preferred_element_type=jnp.float32) + b2_ref[li]

    # 4) final layernorm.
    x = _layernorm(x, lnfw_ref[...], lnfb_ref[...])

    # 5) assemble the lane-dense [B*HP, WP*C] = [8, 128] output slab.
    o_ref[...] = jnp.concatenate(
        [x[wp * ROWS:(wp + 1) * ROWS, :] for wp in range(WP)], axis=1)


# --------------------------- forward-pass wrapper ---------------------------
@jax.jit
def wav_audio_deit(audio, params):
    frames_wide = audio.reshape(ROWS, P * FRAME)        # pure reshape: [8, 128]
    out_wide = pl.pallas_call(
        fused_forward_kernel,
        out_shape=jax.ShapeDtypeStruct((ROWS, WIDE), jnp.float32),
    )(frames_wide, params["dft_block"], params["wtok"], params["posbias"],
      params["attn_mask"],
      params["ln1w"], params["ln1b"], params["wqkv"], params["bqkv"],
      params["wo"], params["bo"], params["ln2w"], params["ln2b"],
      params["w1"], params["b1"], params["w2"], params["b2"],
      params["lnfw"], params["lnfb"])
    # unflatten(-2, (HP, -1)).flatten(2).unsqueeze(1) glue == plain reshape.
    return out_wide.reshape(B, HP, WP * C)[:, None, :, :]


# ------------------------------ parameters ----------------------------------
def sinusoidal_pos_encoding(seq_len, d_model):
    pos = jnp.arange(seq_len, dtype=jnp.float32)[:, None]
    i = jnp.arange(0, d_model, 2, dtype=jnp.float32)
    div = jnp.exp(-jnp.log(10000.0) * i / d_model)
    pe = jnp.zeros((seq_len, d_model), jnp.float32)
    pe = pe.at[:, 0::2].set(jnp.sin(pos * div))
    pe = pe.at[:, 1::2].set(jnp.cos(pos * div))
    return pe


def init_params(key):
    scale = 0.02

    def nrm(k, shape):
        return scale * jax.random.normal(k, shape, dtype=jnp.float32)

    keys = jax.random.split(key, 1 + NUM_LAYERS)
    params = {}

    # DFT basis, block-diagonal over the P frames packed per wide row: [128, 128].
    n = jnp.arange(FRAME, dtype=jnp.float32)[:, None]
    kk = jnp.arange(F, dtype=jnp.float32)[None, :]
    ang = 2.0 * jnp.pi * n * kk / FRAME
    cosm, sinm = jnp.cos(ang), -jnp.sin(ang)
    eye_p = jnp.eye(P, dtype=jnp.float32)
    params["dft_block"] = jnp.concatenate(
        [jnp.kron(eye_p, cosm), jnp.kron(eye_p, sinm)], axis=1)   # [P*FRAME, 2*PF]

    # Patch embedding (Conv2d(1, C, P, stride=P) as [P*P, C] matmul), re-laid out
    # per freq-patch wp so it consumes the [ROWS, PF] wide spectrogram directly.
    kp = jax.random.split(keys[0], 2)
    patch_w = nrm(kp[0], (P * P, C))                              # [pi*P+pj, c]
    patch_b = jnp.zeros((1, C), jnp.float32)
    wp4 = patch_w.reshape(P, P, C)
    wtok = jnp.zeros((WP, PF, C), jnp.float32)
    for wp in range(WP):
        for pi in range(P):
            wtok = wtok.at[wp, pi * F + wp * P: pi * F + wp * P + P, :].set(wp4[pi])
    params["wtok"] = wtok                                         # [WP, PF, C]

    # Positional encoding + conv bias in the wp-major token order.
    pos_enc = sinusoidal_pos_encoding(N, C)
    u = jnp.arange(NTOK)
    wp_idx = u // ROWS
    r_idx = u % ROWS
    hp_idx = r_idx % HP
    b_idx = r_idx // HP
    n_idx = hp_idx * WP + wp_idx
    params["posbias"] = pos_enc[n_idx] + patch_b                  # [NTOK, C]

    # Additive mask so that tokens only attend within their own batch element.
    same_b = b_idx[:, None] == b_idx[None, :]
    params["attn_mask"] = jnp.where(same_b, 0.0, -1e9).astype(jnp.float32)

    # Encoder layers, stacked over a leading layer axis; QKV fused to [C, 3C].
    ln1w, ln1b, wqkv, bqkv, wo, bo = [], [], [], [], [], []
    ln2w, ln2b, w1, b1, w2, b2 = [], [], [], [], [], []
    for li in range(NUM_LAYERS):
        kl = jax.random.split(keys[1 + li], 6)
        ln1w.append(jnp.ones((1, C), jnp.float32))
        ln1b.append(jnp.zeros((1, C), jnp.float32))
        wqkv.append(jnp.concatenate([nrm(kl[0], (C, C)), nrm(kl[1], (C, C)),
                                     nrm(kl[2], (C, C))], axis=1))
        bqkv.append(jnp.zeros((1, 3 * C), jnp.float32))
        wo.append(nrm(kl[3], (C, C)))
        bo.append(jnp.zeros((1, C), jnp.float32))
        ln2w.append(jnp.ones((1, C), jnp.float32))
        ln2b.append(jnp.zeros((1, C), jnp.float32))
        w1.append(nrm(kl[4], (C, MLP)))
        b1.append(jnp.zeros((1, MLP), jnp.float32))
        w2.append(nrm(kl[5], (MLP, C)))
        b2.append(jnp.zeros((1, C), jnp.float32))
    params.update(
        ln1w=jnp.stack(ln1w), ln1b=jnp.stack(ln1b),
        wqkv=jnp.stack(wqkv), bqkv=jnp.stack(bqkv),
        wo=jnp.stack(wo), bo=jnp.stack(bo),
        ln2w=jnp.stack(ln2w), ln2b=jnp.stack(ln2b),
        w1=jnp.stack(w1), b1=jnp.stack(b1),
        w2=jnp.stack(w2), b2=jnp.stack(b2),
        lnfw=jnp.ones((1, C), jnp.float32),
        lnfb=jnp.zeros((1, C), jnp.float32))
    return params


# --------------------------------- main -------------------------------------
if __name__ == "__main__":
    key = jax.random.PRNGKey(0)
    k_audio, k_param = jax.random.split(key)
    audio = jax.random.normal(k_audio, (B, NSAMP), dtype=jnp.float32)
    params = init_params(k_param)

    out = wav_audio_deit(audio, params)
    out = jax.block_until_ready(out)
    assert out.shape == (B, 1, HP, WP * C), out.shape
    assert bool(jnp.all(jnp.isfinite(out)))
    print("KERNEL_OK")
</pallas_src>

<mosaic_0001>
module attributes {stable_mosaic.version = 11 : i64} {
  func.func @fused_forward_kernel(%arg0: memref<8x128xf32, #tpu.memory_space<vmem>>, %arg1: memref<128x128xf32, #tpu.memory_space<vmem>>, %arg2: memref<4x64x32xf32, #tpu.memory_space<vmem>>, %arg3: memref<32x32xf32, #tpu.memory_space<vmem>>, %arg4: memref<32x32xf32, #tpu.memory_space<vmem>>, %arg5: memref<2x1x32xf32, #tpu.memory_space<vmem>>, %arg6: memref<2x1x32xf32, #tpu.memory_space<vmem>>, %arg7: memref<2x32x96xf32, #tpu.memory_space<vmem>>, %arg8: memref<2x1x96xf32, #tpu.memory_space<vmem>>, %arg9: memref<2x32x32xf32, #tpu.memory_space<vmem>>, %arg10: memref<2x1x32xf32, #tpu.memory_space<vmem>>, %arg11: memref<2x1x32xf32, #tpu.memory_space<vmem>>, %arg12: memref<2x1x32xf32, #tpu.memory_space<vmem>>, %arg13: memref<2x32x128xf32, #tpu.memory_space<vmem>>, %arg14: memref<2x1x128xf32, #tpu.memory_space<vmem>>, %arg15: memref<2x128x32xf32, #tpu.memory_space<vmem>>, %arg16: memref<2x1x32xf32, #tpu.memory_space<vmem>>, %arg17: memref<1x32xf32, #tpu.memory_space<vmem>>, %arg18: memref<1x32xf32, #tpu.memory_space<vmem>>, %arg19: memref<8x128xf32, #tpu.memory_space<vmem>>) attributes {dimension_semantics = [], scalar_prefetch = 0 : i64, scratch_operands = 0 : i64, tpu.core_type = #tpu.core_type<tc>} {
    %c0 = arith.constant 0 : index
    %c0_0 = arith.constant 0 : index
    %0 = vector.load %arg0[%c0, %c0_0] : memref<8x128xf32, #tpu.memory_space<vmem>>, vector<8x128xf32>
    %c0_1 = arith.constant 0 : index
    %c0_2 = arith.constant 0 : index
    %1 = vector.load %arg1[%c0_1, %c0_2] : memref<128x128xf32, #tpu.memory_space<vmem>>, vector<128x128xf32>
    %cst = arith.constant dense<0.000000e+00> : vector<8x128xf32>
    %2 = tpu.matmul %0, %1, %cst {dimension_numbers = #tpu.dot_dimension_numbers<[1], [0], [0], [1], [0, 0, 1, 1], [], []>} : vector<8x128xf32>, vector<128x128xf32>, vector<8x128xf32> -> vector<8x128xf32>
    %3 = vector.extract_strided_slice %2 {offsets = [0, 0], sizes = [8, 64], strides = [1, 1]} : vector<8x128xf32> to vector<8x64xf32>
    %4 = vector.extract_strided_slice %2 {offsets = [0, 64], sizes = [8, 64], strides = [1, 1]} : vector<8x128xf32> to vector<8x64xf32>
    %5 = arith.mulf %3, %3 : vector<8x64xf32>
    %6 = arith.mulf %4, %4 : vector<8x64xf32>
    %7 = arith.addf %5, %6 : vector<8x64xf32>
    %c0_3 = arith.constant 0 : index
    %c0_4 = arith.constant 0 : index
    %c0_5 = arith.constant 0 : index
    %8 = vector.load %arg2[%c0_3, %c0_4, %c0_5] : memref<4x64x32xf32, #tpu.memory_space<vmem>>, vector<1x64x32xf32>
    %9 = vector.shape_cast %8 : vector<1x64x32xf32> to vector<64x32xf32>
    %cst_6 = arith.constant dense<0.000000e+00> : vector<8x32xf32>
    %10 = tpu.matmul %7, %9, %cst_6 {dimension_numbers = #tpu.dot_dimension_numbers<[1], [0], [0], [1], [0, 0, 1, 1], [], []>} : vector<8x64xf32>, vector<64x32xf32>, vector<8x32xf32> -> vector<8x32xf32>
    %c1 = arith.constant 1 : index
    %c0_7 = arith.constant 0 : index
    %c0_8 = arith.constant 0 : index
    %11 = vector.load %arg2[%c1, %c0_7, %c0_8] : memref<4x64x32xf32, #tpu.memory_space<vmem>>, vector<1x64x32xf32>
    %12 = vector.shape_cast %11 : vector<1x64x32xf32> to vector<64x32xf32>
    %cst_9 = arith.constant dense<0.000000e+00> : vector<8x32xf32>
    %13 = tpu.matmul %7, %12, %cst_9 {dimension_numbers = #tpu.dot_dimension_numbers<[1], [0], [0], [1], [0, 0, 1, 1], [], []>} : vector<8x64xf32>, vector<64x32xf32>, vector<8x32xf32> -> vector<8x32xf32>
    %c2 = arith.constant 2 : index
    %c0_10 = arith.constant 0 : index
    %c0_11 = arith.constant 0 : index
    %14 = vector.load %arg2[%c2, %c0_10, %c0_11] : memref<4x64x32xf32, #tpu.memory_space<vmem>>, vector<1x64x32xf32>
    %15 = vector.shape_cast %14 : vector<1x64x32xf32> to vector<64x32xf32>
    %cst_12 = arith.constant dense<0.000000e+00> : vector<8x32xf32>
    %16 = tpu.matmul %7, %15, %cst_12 {dimension_numbers = #tpu.dot_dimension_numbers<[1], [0], [0], [1], [0, 0, 1, 1], [], []>} : vector<8x64xf32>, vector<64x32xf32>, vector<8x32xf32> -> vector<8x32xf32>
    %c3 = arith.constant 3 : index
    %c0_13 = arith.constant 0 : index
    %c0_14 = arith.constant 0 : index
    %17 = vector.load %arg2[%c3, %c0_13, %c0_14] : memref<4x64x32xf32, #tpu.memory_space<vmem>>, vector<1x64x32xf32>
    %18 = vector.shape_cast %17 : vector<1x64x32xf32> to vector<64x32xf32>
    %cst_15 = arith.constant dense<0.000000e+00> : vector<8x32xf32>
    %19 = tpu.matmul %7, %18, %cst_15 {dimension_numbers = #tpu.dot_dimension_numbers<[1], [0], [0], [1], [0, 0, 1, 1], [], []>} : vector<8x64xf32>, vector<64x32xf32>, vector<8x32xf32> -> vector<8x32xf32>
    %20 = tpu.concatenate %10, %13, %16, %19 in 0 : vector<8x32xf32>, vector<8x32xf32>, vector<8x32xf32>, vector<8x32xf32> -> vector<32x32xf32>
    %c0_16 = arith.constant 0 : index
    %c0_17 = arith.constant 0 : index
    %21 = vector.load %arg3[%c0_16, %c0_17] : memref<32x32xf32, #tpu.memory_space<vmem>>, vector<32x32xf32>
    %22 = arith.addf %20, %21 : vector<32x32xf32>
    %c0_18 = arith.constant 0 : index
    %c0_19 = arith.constant 0 : index
    %23 = vector.load %arg4[%c0_18, %c0_19] : memref<32x32xf32, #tpu.memory_space<vmem>>, vector<32x32xf32>
    %c0_20 = arith.constant 0 : index
    %c0_21 = arith.constant 0 : index
    %c0_22 = arith.constant 0 : index
    %24 = vector.load %arg5[%c0_20, %c0_21, %c0_22] : memref<2x1x32xf32, #tpu.memory_space<vmem>>, vector<1x1x32xf32>
    %25 = vector.shape_cast %24 : vector<1x1x32xf32> to vector<1x32xf32>
    %c0_23 = arith.constant 0 : index
    %c0_24 = arith.constant 0 : index
    %c0_25 = arith.constant 0 : index
    %26 = vector.load %arg6[%c0_23, %c0_24, %c0_25] : memref<2x1x32xf32, #tpu.memory_space<vmem>>, vector<1x1x32xf32>
    %27 = vector.shape_cast %26 : vector<1x1x32xf32> to vector<1x32xf32>
    %cst_26 = arith.constant dense<0.000000e+00> : vector<32xf32>
    %28 = vector.multi_reduction <add>, %22, %cst_26 [1] : vector<32x32xf32> to vector<32xf32>
    %29 = vector.shape_cast %28 : vector<32xf32> to vector<32x1xf32>
    %cst_27 = arith.constant 3.200000e+01 : f32
    %30 = vector.broadcast %cst_27 : f32 to vector<32x1xf32>
    %31 = arith.divf %29, %30 : vector<32x1xf32>
    %32 = vector.broadcast %31 : vector<32x1xf32> to vector<32x32xf32>
    %33 = arith.subf %22, %32 : vector<32x32xf32>
    %34 = arith.mulf %33, %33 : vector<32x32xf32>
    %cst_28 = arith.constant dense<0.000000e+00> : vector<32xf32>
    %35 = vector.multi_reduction <add>, %34, %cst_28 [1] : vector<32x32xf32> to vector<32xf32>
    %36 = vector.shape_cast %35 : vector<32xf32> to vector<32x1xf32>
    %cst_29 = arith.constant 3.200000e+01 : f32
    %37 = vector.broadcast %cst_29 : f32 to vector<32x1xf32>
    %38 = arith.divf %36, %37 : vector<32x1xf32>
    %39 = vector.broadcast %31 : vector<32x1xf32> to vector<32x32xf32>
    %40 = arith.subf %22, %39 : vector<32x32xf32>
    %cst_30 = arith.constant 9.99999996E-13 : f32
    %41 = vector.broadcast %cst_30 : f32 to vector<32x1xf32>
    %42 = arith.addf %38, %41 : vector<32x1xf32>
    %43 = math.rsqrt %42 : vector<32x1xf32>
    %44 = vector.broadcast %43 : vector<32x1xf32> to vector<32x32xf32>
    %45 = arith.mulf %40, %44 : vector<32x32xf32>
    %46 = vector.broadcast %25 : vector<1x32xf32> to vector<32x32xf32>
    %47 = arith.mulf %45, %46 : vector<32x32xf32>
    %48 = vector.broadcast %27 : vector<1x32xf32> to vector<32x32xf32>
    %49 = arith.addf %47, %48 : vector<32x32xf32>
    %c0_31 = arith.constant 0 : index
    %c0_32 = arith.constant 0 : index
    %c0_33 = arith.constant 0 : index
    %50 = vector.load %arg7[%c0_31, %c0_32, %c0_33] : memref<2x32x96xf32, #tpu.memory_space<vmem>>, vector<1x32x96xf32>
    %51 = vector.shape_cast %50 : vector<1x32x96xf32> to vector<32x96xf32>
    %cst_34 = arith.constant dense<0.000000e+00> : vector<32x96xf32>
    %52 = tpu.matmul %49, %51, %cst_34 {dimension_numbers = #tpu.dot_dimension_numbers<[1], [0], [0], [1], [0, 0, 1, 1], [], []>} : vector<32x32xf32>, vector<32x96xf32>, vector<32x96xf32> -> vector<32x96xf32>
    %c0_35 = arith.constant 0 : index
    %c0_36 = arith.constant 0 : index
    %c0_37 = arith.constant 0 : index
    %53 = vector.load %arg8[%c0_35, %c0_36, %c0_37] : memref<2x1x96xf32, #tpu.memory_space<vmem>>, vector<1x1x96xf32>
    %54 = vector.shape_cast %53 : vector<1x1x96xf32> to vector<1x96xf32>
    %55 = vector.broadcast %54 : vector<1x96xf32> to vector<32x96xf32>
    %56 = arith.addf %52, %55 : vector<32x96xf32>
    %57 = vector.extract_strided_slice %56 {offsets = [0, 0], sizes = [32, 32], strides = [1, 1]} : vector<32x96xf32> to vector<32x32xf32>
    %58 = vector.extract_strided_slice %56 {offsets = [0, 32], sizes = [32, 32], strides = [1, 1]} : vector<32x96xf32> to vector<32x32xf32>
    %59 = vector.extract_strided_slice %56 {offsets = [0, 64], sizes = [32, 32], strides = [1, 1]} : vector<32x96xf32> to vector<32x32xf32>
    %c0_38 = arith.constant 0 : index
    %c0_39 = arith.constant 0 : index
    %c0_40 = arith.constant 0 : index
    %60 = vector.load %arg9[%c0_38, %c0_39, %c0_40] : memref<2x32x32xf32, #tpu.memory_space<vmem>>, vector<1x32x32xf32>
    %61 = vector.shape_cast %60 : vector<1x32x32xf32> to vector<32x32xf32>
    %cst_41 = arith.constant 0.000000e+00 : f32
    %62 = vector.broadcast %cst_41 : f32 to vector<32x32xf32>
    %63 = vector.extract_strided_slice %57 {offsets = [0, 0], sizes = [32, 16], strides = [1, 1]} : vector<32x32xf32> to vector<32x16xf32>
    %64 = vector.extract_strided_slice %58 {offsets = [0, 0], sizes = [32, 16], strides = [1, 1]} : vector<32x32xf32> to vector<32x16xf32>
    %65 = vector.extract_strided_slice %59 {offsets = [0, 0], sizes = [32, 16], strides = [1, 1]} : vector<32x32xf32> to vector<32x16xf32>
    %cst_42 = arith.constant dense<0.000000e+00> : vector<32x32xf32>
    %66 = tpu.matmul %63, %64, %cst_42 {dimension_numbers = #tpu.dot_dimension_numbers<[1], [1], [0], [0], [0, 0, 1, 0], [], []>} : vector<32x16xf32>, vector<32x16xf32>, vector<32x32xf32> -> vector<32x32xf32>
    %cst_43 = arith.constant 2.500000e-01 : f32
    %67 = vector.broadcast %cst_43 : f32 to vector<32x32xf32>
    %68 = arith.mulf %66, %67 : vector<32x32xf32>
    %69 = arith.addf %68, %23 : vector<32x32xf32>
    %cst_44 = arith.constant dense<0xFF800000> : vector<32xf32>
    %70 = vector.multi_reduction <maximumf>, %69, %cst_44 [1] : vector<32x32xf32> to vector<32xf32>
    %71 = vector.shape_cast %70 : vector<32xf32> to vector<32x1xf32>
    %72 = vector.broadcast %71 : vector<32x1xf32> to vector<32x32xf32>
    %73 = arith.subf %69, %72 : vector<32x32xf32>
    %74 = math.exp %73 : vector<32x32xf32>
    %cst_45 = arith.constant dense<0.000000e+00> : vector<32xf32>
    %75 = vector.multi_reduction <add>, %74, %cst_45 [1] : vector<32x32xf32> to vector<32xf32>
    %76 = vector.shape_cast %75 : vector<32xf32> to vector<32x1xf32>
    %77 = tpu.reciprocal %76 {approx = true} : vector<32x1xf32> -> vector<32x1xf32>
    %78 = vector.broadcast %77 : vector<32x1xf32> to vector<32x32xf32>
    %79 = arith.mulf %74, %78 : vector<32x32xf32>
    %cst_46 = arith.constant dense<0.000000e+00> : vector<32x16xf32>
    %80 = tpu.matmul %79, %65, %cst_46 {dimension_numbers = #tpu.dot_dimension_numbers<[1], [0], [0], [1], [0, 0, 1, 1], [], []>} : vector<32x32xf32>, vector<32x16xf32>, vector<32x16xf32> -> vector<32x16xf32>
    %81 = vector.extract_strided_slice %61 {offsets = [0, 0], sizes = [16, 32], strides = [1, 1]} : vector<32x32xf32> to vector<16x32xf32>
    %cst_47 = arith.constant dense<0.000000e+00> : vector<32x32xf32>
    %82 = tpu.matmul %80, %81, %cst_47 {dimension_numbers = #tpu.dot_dimension_numbers<[1], [0], [0], [1], [0, 0, 1, 1], [], []>} : vector<32x16xf32>, vector<16x32xf32>, vector<32x32xf32> -> vector<32x32xf32>
    %83 = arith.addf %62, %82 : vector<32x32xf32>
    %84 = vector.extract_strided_slice %57 {offsets = [0, 16], sizes = [32, 16], strides = [1, 1]} : vector<32x32xf32> to vector<32x16xf32>
    %85 = vector.extract_strided_slice %58 {offsets = [0, 16], sizes = [32, 16], strides = [1, 1]} : vector<32x32xf32> to vector<32x16xf32>
    %86 = vector.extract_strided_slice %59 {offsets = [0, 16], sizes = [32, 16], strides = [1, 1]} : vector<32x32xf32> to vector<32x16xf32>
    %cst_48 = arith.constant dense<0.000000e+00> : vector<32x32xf32>
    %87 = tpu.matmul %84, %85, %cst_48 {dimension_numbers = #tpu.dot_dimension_numbers<[1], [1], [0], [0], [0, 0, 1, 0], [], []>} : vector<32x16xf32>, vector<32x16xf32>, vector<32x32xf32> -> vector<32x32xf32>
    %cst_49 = arith.constant 2.500000e-01 : f32
    %88 = vector.broadcast %cst_49 : f32 to vector<32x32xf32>
    %89 = arith.mulf %87, %88 : vector<32x32xf32>
    %90 = arith.addf %89, %23 : vector<32x32xf32>
    %cst_50 = arith.constant dense<0xFF800000> : vector<32xf32>
    %91 = vector.multi_reduction <maximumf>, %90, %cst_50 [1] : vector<32x32xf32> to vector<32xf32>
    %92 = vector.shape_cast %91 : vector<32xf32> to vector<32x1xf32>
    %93 = vector.broadcast %92 : vector<32x1xf32> to vector<32x32xf32>
    %94 = arith.subf %90, %93 : vector<32x32xf32>
    %95 = math.exp %94 : vector<32x32xf32>
    %cst_51 = arith.constant dense<0.000000e+00> : vector<32xf32>
    %96 = vector.multi_reduction <add>, %95, %cst_51 [1] : vector<32x32xf32> to vector<32xf32>
    %97 = vector.shape_cast %96 : vector<32xf32> to vector<32x1xf32>
    %98 = tpu.reciprocal %97 {approx = true} : vector<32x1xf32> -> vector<32x1xf32>
    %99 = vector.broadcast %98 : vector<32x1xf32> to vector<32x32xf32>
    %100 = arith.mulf %95, %99 : vector<32x32xf32>
    %cst_52 = arith.constant dense<0.000000e+00> : vector<32x16xf32>
    %101 = tpu.matmul %100, %86, %cst_52 {dimension_numbers = #tpu.dot_dimension_numbers<[1], [0], [0], [1], [0, 0, 1, 1], [], []>} : vector<32x32xf32>, vector<32x16xf32>, vector<32x16xf32> -> vector<32x16xf32>
    %102 = vector.extract_strided_slice %61 {offsets = [16, 0], sizes = [16, 32], strides = [1, 1]} : vector<32x32xf32> to vector<16x32xf32>
    %cst_53 = arith.constant dense<0.000000e+00> : vector<32x32xf32>
    %103 = tpu.matmul %101, %102, %cst_53 {dimension_numbers = #tpu.dot_dimension_numbers<[1], [0], [0], [1], [0, 0, 1, 1], [], []>} : vector<32x16xf32>, vector<16x32xf32>, vector<32x32xf32> -> vector<32x32xf32>
    %104 = arith.addf %83, %103 : vector<32x32xf32>
    %105 = arith.addf %22, %104 : vector<32x32xf32>
    %c0_54 = arith.constant 0 : index
    %c0_55 = arith.constant 0 : index
    %c0_56 = arith.constant 0 : index
    %106 = vector.load %arg10[%c0_54, %c0_55, %c0_56] : memref<2x1x32xf32, #tpu.memory_space<vmem>>, vector<1x1x32xf32>
    %107 = vector.shape_cast %106 : vector<1x1x32xf32> to vector<1x32xf32>
    %108 = vector.broadcast %107 : vector<1x32xf32> to vector<32x32xf32>
    %109 = arith.addf %105, %108 : vector<32x32xf32>
    %c0_57 = arith.constant 0 : index
    %c0_58 = arith.constant 0 : index
    %c0_59 = arith.constant 0 : index
    %110 = vector.load %arg11[%c0_57, %c0_58, %c0_59] : memref<2x1x32xf32, #tpu.memory_space<vmem>>, vector<1x1x32xf32>
    %111 = vector.shape_cast %110 : vector<1x1x32xf32> to vector<1x32xf32>
    %c0_60 = arith.constant 0 : index
    %c0_61 = arith.constant 0 : index
    %c0_62 = arith.constant 0 : index
    %112 = vector.load %arg12[%c0_60, %c0_61, %c0_62] : memref<2x1x32xf32, #tpu.memory_space<vmem>>, vector<1x1x32xf32>
    %113 = vector.shape_cast %112 : vector<1x1x32xf32> to vector<1x32xf32>
    %cst_63 = arith.constant dense<0.000000e+00> : vector<32xf32>
    %114 = vector.multi_reduction <add>, %109, %cst_63 [1] : vector<32x32xf32> to vector<32xf32>
    %115 = vector.shape_cast %114 : vector<32xf32> to vector<32x1xf32>
    %cst_64 = arith.constant 3.200000e+01 : f32
    %116 = vector.broadcast %cst_64 : f32 to vector<32x1xf32>
    %117 = arith.divf %115, %116 : vector<32x1xf32>
    %118 = vector.broadcast %117 : vector<32x1xf32> to vector<32x32xf32>
    %119 = arith.subf %109, %118 : vector<32x32xf32>
    %120 = arith.mulf %119, %119 : vector<32x32xf32>
    %cst_65 = arith.constant dense<0.000000e+00> : vector<32xf32>
    %121 = vector.multi_reduction <add>, %120, %cst_65 [1] : vector<32x32xf32> to vector<32xf32>
    %122 = vector.shape_cast %121 : vector<32xf32> to vector<32x1xf32>
    %cst_66 = arith.constant 3.200000e+01 : f32
    %123 = vector.broadcast %cst_66 : f32 to vector<32x1xf32>
    %124 = arith.divf %122, %123 : vector<32x1xf32>
    %125 = vector.broadcast %117 : vector<32x1xf32> to vector<32x32xf32>
    %126 = arith.subf %109, %125 : vector<32x32xf32>
    %cst_67 = arith.constant 9.99999996E-13 : f32
    %127 = vector.broadcast %cst_67 : f32 to vector<32x1xf32>
    %128 = arith.addf %124, %127 : vector<32x1xf32>
    %129 = math.rsqrt %128 : vector<32x1xf32>
    %130 = vector.broadcast %129 : vector<32x1xf32> to vector<32x32xf32>
    %131 = arith.mulf %126, %130 : vector<32x32xf32>
    %132 = vector.broadcast %111 : vector<1x32xf32> to vector<32x32xf32>
    %133 = arith.mulf %131, %132 : vector<32x32xf32>
    %134 = vector.broadcast %113 : vector<1x32xf32> to vector<32x32xf32>
    %135 = arith.addf %133, %134 : vector<32x32xf32>
    %c0_68 = arith.constant 0 : index
    %c0_69 = arith.constant 0 : index
    %c0_70 = arith.constant 0 : index
    %136 = vector.load %arg13[%c0_68, %c0_69, %c0_70] : memref<2x32x128xf32, #tpu.memory_space<vmem>>, vector<1x32x128xf32>
    %137 = vector.shape_cast %136 : vector<1x32x128xf32> to vector<32x128xf32>
    %cst_71 = arith.constant dense<0.000000e+00> : vector<32x128xf32>
    %138 = tpu.matmul %135, %137, %cst_71 {dimension_numbers = #tpu.dot_dimension_numbers<[1], [0], [0], [1], [0, 0, 1, 1], [], []>} : vector<32x32xf32>, vector<32x128xf32>, vector<32x128xf32> -> vector<32x128xf32>
    %c0_72 = arith.constant 0 : index
    %c0_73 = arith.constant 0 : index
    %c0_74 = arith.constant 0 : index
    %139 = vector.load %arg14[%c0_72, %c0_73, %c0_74] : memref<2x1x128xf32, #tpu.memory_space<vmem>>, vector<1x1x128xf32>
    %140 = vector.shape_cast %139 : vector<1x1x128xf32> to vector<1x128xf32>
    %141 = vector.broadcast %140 : vector<1x128xf32> to vector<32x128xf32>
    %142 = arith.addf %138, %141 : vector<32x128xf32>
    %143 = arith.mulf %142, %142 : vector<32x128xf32>
    %144 = arith.mulf %142, %143 : vector<32x128xf32>
    %cst_75 = arith.constant 4.471500e-02 : f32
    %145 = vector.broadcast %cst_75 : f32 to vector<32x128xf32>
    %146 = arith.mulf %145, %144 : vector<32x128xf32>
    %147 = arith.addf %142, %146 : vector<32x128xf32>
    %cst_76 = arith.constant 0.797884583 : f32
    %148 = vector.broadcast %cst_76 : f32 to vector<32x128xf32>
    %149 = arith.mulf %148, %147 : vector<32x128xf32>
    %150 = math.tanh %149 : vector<32x128xf32>
    %cst_77 = arith.constant 1.000000e+00 : f32
    %151 = vector.broadcast %cst_77 : f32 to vector<32x128xf32>
    %152 = arith.addf %151, %150 : vector<32x128xf32>
    %cst_78 = arith.constant 5.000000e-01 : f32
    %153 = vector.broadcast %cst_78 : f32 to vector<32x128xf32>
    %154 = arith.mulf %153, %152 : vector<32x128xf32>
    %155 = arith.mulf %142, %154 : vector<32x128xf32>
    %c0_79 = arith.constant 0 : index
    %c0_80 = arith.constant 0 : index
    %c0_81 = arith.constant 0 : index
    %156 = vector.load %arg15[%c0_79, %c0_80, %c0_81] : memref<2x128x32xf32, #tpu.memory_space<vmem>>, vector<1x128x32xf32>
    %157 = vector.shape_cast %156 : vector<1x128x32xf32> to vector<128x32xf32>
    %cst_82 = arith.constant dense<0.000000e+00> : vector<32x32xf32>
    %158 = tpu.matmul %155, %157, %cst_82 {dimension_numbers = #tpu.dot_dimension_numbers<[1], [0], [0], [1], [0, 0, 1, 1], [], []>} : vector<32x128xf32>, vector<128x32xf32>, vector<32x32xf32> -> vector<32x32xf32>
    %159 = arith.addf %109, %158 : vector<32x32xf32>
    %c0_83 = arith.constant 0 : index
    %c0_84 = arith.constant 0 : index
    %c0_85 = arith.constant 0 : index
    %160 = vector.load %arg16[%c0_83, %c0_84, %c0_85] : memref<2x1x32xf32, #tpu.memory_space<vmem>>, vector<1x1x32xf32>
    %161 = vector.shape_cast %160 : vector<1x1x32xf32> to vector<1x32xf32>
    %162 = vector.broadcast %161 : vector<1x32xf32> to vector<32x32xf32>
    %163 = arith.addf %159, %162 : vector<32x32xf32>
    %c1_86 = arith.constant 1 : index
    %c0_87 = arith.constant 0 : index
    %c0_88 = arith.constant 0 : index
    %164 = vector.load %arg5[%c1_86, %c0_87, %c0_88] : memref<2x1x32xf32, #tpu.memory_space<vmem>>, vector<1x1x32xf32>
    %165 = vector.shape_cast %164 : vector<1x1x32xf32> to vector<1x32xf32>
    %c1_89 = arith.constant 1 : index
    %c0_90 = arith.constant 0 : index
    %c0_91 = arith.constant 0 : index
    %166 = vector.load %arg6[%c1_89, %c0_90, %c0_91] : memref<2x1x32xf32, #tpu.memory_space<vmem>>, vector<1x1x32xf32>
    %167 = vector.shape_cast %166 : vector<1x1x32xf32> to vector<1x32xf32>
    %cst_92 = arith.constant dense<0.000000e+00> : vector<32xf32>
    %168 = vector.multi_reduction <add>, %163, %cst_92 [1] : vector<32x32xf32> to vector<32xf32>
    %169 = vector.shape_cast %168 : vector<32xf32> to vector<32x1xf32>
    %cst_93 = arith.constant 3.200000e+01 : f32
    %170 = vector.broadcast %cst_93 : f32 to vector<32x1xf32>
    %171 = arith.divf %169, %170 : vector<32x1xf32>
    %172 = vector.broadcast %171 : vector<32x1xf32> to vector<32x32xf32>
    %173 = arith.subf %163, %172 : vector<32x32xf32>
    %174 = arith.mulf %173, %173 : vector<32x32xf32>
    %cst_94 = arith.constant dense<0.000000e+00> : vector<32xf32>
    %175 = vector.multi_reduction <add>, %174, %cst_94 [1] : vector<32x32xf32> to vector<32xf32>
    %176 = vector.shape_cast %175 : vector<32xf32> to vector<32x1xf32>
    %cst_95 = arith.constant 3.200000e+01 : f32
    %177 = vector.broadcast %cst_95 : f32 to vector<32x1xf32>
    %178 = arith.divf %176, %177 : vector<32x1xf32>
    %179 = vector.broadcast %171 : vector<32x1xf32> to vector<32x32xf32>
    %180 = arith.subf %163, %179 : vector<32x32xf32>
    %cst_96 = arith.constant 9.99999996E-13 : f32
    %181 = vector.broadcast %cst_96 : f32 to vector<32x1xf32>
    %182 = arith.addf %178, %181 : vector<32x1xf32>
    %183 = math.rsqrt %182 : vector<32x1xf32>
    %184 = vector.broadcast %183 : vector<32x1xf32> to vector<32x32xf32>
    %185 = arith.mulf %180, %184 : vector<32x32xf32>
    %186 = vector.broadcast %165 : vector<1x32xf32> to vector<32x32xf32>
    %187 = arith.mulf %185, %186 : vector<32x32xf32>
    %188 = vector.broadcast %167 : vector<1x32xf32> to vector<32x32xf32>
    %189 = arith.addf %187, %188 : vector<32x32xf32>
    %c1_97 = arith.constant 1 : index
    %c0_98 = arith.constant 0 : index
    %c0_99 = arith.constant 0 : index
    %190 = vector.load %arg7[%c1_97, %c0_98, %c0_99] : memref<2x32x96xf32, #tpu.memory_space<vmem>>, vector<1x32x96xf32>
    %191 = vector.shape_cast %190 : vector<1x32x96xf32> to vector<32x96xf32>
    %cst_100 = arith.constant dense<0.000000e+00> : vector<32x96xf32>
    %192 = tpu.matmul %189, %191, %cst_100 {dimension_numbers = #tpu.dot_dimension_numbers<[1], [0], [0], [1], [0, 0, 1, 1], [], []>} : vector<32x32xf32>, vector<32x96xf32>, vector<32x96xf32> -> vector<32x96xf32>
    %c1_101 = arith.constant 1 : index
    %c0_102 = arith.constant 0 : index
    %c0_103 = arith.constant 0 : index
    %193 = vector.load %arg8[%c1_101, %c0_102, %c0_103] : memref<2x1x96xf32, #tpu.memory_space<vmem>>, vector<1x1x96xf32>
    %194 = vector.shape_cast %193 : vector<1x1x96xf32> to vector<1x96xf32>
    %195 = vector.broadcast %194 : vector<1x96xf32> to vector<32x96xf32>
    %196 = arith.addf %192, %195 : vector<32x96xf32>
    %197 = vector.extract_strided_slice %196 {offsets = [0, 0], sizes = [32, 32], strides = [1, 1]} : vector<32x96xf32> to vector<32x32xf32>
    %198 = vector.extract_strided_slice %196 {offsets = [0, 32], sizes = [32, 32], strides = [1, 1]} : vector<32x96xf32> to vector<32x32xf32>
    %199 = vector.extract_strided_slice %196 {offsets = [0, 64], sizes = [32, 32], strides = [1, 1]} : vector<32x96xf32> to vector<32x32xf32>
    %c1_104 = arith.constant 1 : index
    %c0_105 = arith.constant 0 : index
    %c0_106 = arith.constant 0 : index
    %200 = vector.load %arg9[%c1_104, %c0_105, %c0_106] : memref<2x32x32xf32, #tpu.memory_space<vmem>>, vector<1x32x32xf32>
    %201 = vector.shape_cast %200 : vector<1x32x32xf32> to vector<32x32xf32>
    %cst_107 = arith.constant 0.000000e+00 : f32
    %202 = vector.broadcast %cst_107 : f32 to vector<32x32xf32>
    %203 = vector.extract_strided_slice %197 {offsets = [0, 0], sizes = [32, 16], strides = [1, 1]} : vector<32x32xf32> to vector<32x16xf32>
    %204 = vector.extract_strided_slice %198 {offsets = [0, 0], sizes = [32, 16], strides = [1, 1]} : vector<32x32xf32> to vector<32x16xf32>
    %205 = vector.extract_strided_slice %199 {offsets = [0, 0], sizes = [32, 16], strides = [1, 1]} : vector<32x32xf32> to vector<32x16xf32>
    %cst_108 = arith.constant dense<0.000000e+00> : vector<32x32xf32>
    %206 = tpu.matmul %203, %204, %cst_108 {dimension_numbers = #tpu.dot_dimension_numbers<[1], [1], [0], [0], [0, 0, 1, 0], [], []>} : vector<32x16xf32>, vector<32x16xf32>, vector<32x32xf32> -> vector<32x32xf32>
    %cst_109 = arith.constant 2.500000e-01 : f32
    %207 = vector.broadcast %cst_109 : f32 to vector<32x32xf32>
    %208 = arith.mulf %206, %207 : vector<32x32xf32>
    %209 = arith.addf %208, %23 : vector<32x32xf32>
    %cst_110 = arith.constant dense<0xFF800000> : vector<32xf32>
    %210 = vector.multi_reduction <maximumf>, %209, %cst_110 [1] : vector<32x32xf32> to vector<32xf32>
    %211 = vector.shape_cast %210 : vector<32xf32> to vector<32x1xf32>
    %212 = vector.broadcast %211 : vector<32x1xf32> to vector<32x32xf32>
    %213 = arith.subf %209, %212 : vector<32x32xf32>
    %214 = math.exp %213 : vector<32x32xf32>
    %cst_111 = arith.constant dense<0.000000e+00> : vector<32xf32>
    %215 = vector.multi_reduction <add>, %214, %cst_111 [1] : vector<32x32xf32> to vector<32xf32>
    %216 = vector.shape_cast %215 : vector<32xf32> to vector<32x1xf32>
    %217 = tpu.reciprocal %216 {approx = true} : vector<32x1xf32> -> vector<32x1xf32>
    %218 = vector.broadcast %217 : vector<32x1xf32> to vector<32x32xf32>
    %219 = arith.mulf %214, %218 : vector<32x32xf32>
    %cst_112 = arith.constant dense<0.000000e+00> : vector<32x16xf32>
    %220 = tpu.matmul %219, %205, %cst_112 {dimension_numbers = #tpu.dot_dimension_numbers<[1], [0], [0], [1], [0, 0, 1, 1], [], []>} : vector<32x32xf32>, vector<32x16xf32>, vector<32x16xf32> -> vector<32x16xf32>
    %221 = vector.extract_strided_slice %201 {offsets = [0, 0], sizes = [16, 32], strides = [1, 1]} : vector<32x32xf32> to vector<16x32xf32>
    %cst_113 = arith.constant dense<0.000000e+00> : vector<32x32xf32>
    %222 = tpu.matmul %220, %221, %cst_113 {dimension_numbers = #tpu.dot_dimension_numbers<[1], [0], [0], [1], [0, 0, 1, 1], [], []>} : vector<32x16xf32>, vector<16x32xf32>, vector<32x32xf32> -> vector<32x32xf32>
    %223 = arith.addf %202, %222 : vector<32x32xf32>
    %224 = vector.extract_strided_slice %197 {offsets = [0, 16], sizes = [32, 16], strides = [1, 1]} : vector<32x32xf32> to vector<32x16xf32>
    %225 = vector.extract_strided_slice %198 {offsets = [0, 16], sizes = [32, 16], strides = [1, 1]} : vector<32x32xf32> to vector<32x16xf32>
    %226 = vector.extract_strided_slice %199 {offsets = [0, 16], sizes = [32, 16], strides = [1, 1]} : vector<32x32xf32> to vector<32x16xf32>
    %cst_114 = arith.constant dense<0.000000e+00> : vector<32x32xf32>
    %227 = tpu.matmul %224, %225, %cst_114 {dimension_numbers = #tpu.dot_dimension_numbers<[1], [1], [0], [0], [0, 0, 1, 0], [], []>} : vector<32x16xf32>, vector<32x16xf32>, vector<32x32xf32> -> vector<32x32xf32>
    %cst_115 = arith.constant 2.500000e-01 : f32
    %228 = vector.broadcast %cst_115 : f32 to vector<32x32xf32>
    %229 = arith.mulf %227, %228 : vector<32x32xf32>
    %230 = arith.addf %229, %23 : vector<32x32xf32>
    %cst_116 = arith.constant dense<0xFF800000> : vector<32xf32>
    %231 = vector.multi_reduction <maximumf>, %230, %cst_116 [1] : vector<32x32xf32> to vector<32xf32>
    %232 = vector.shape_cast %231 : vector<32xf32> to vector<32x1xf32>
    %233 = vector.broadcast %232 : vector<32x1xf32> to vector<32x32xf32>
    %234 = arith.subf %230, %233 : vector<32x32xf32>
    %235 = math.exp %234 : vector<32x32xf32>
    %cst_117 = arith.constant dense<0.000000e+00> : vector<32xf32>
    %236 = vector.multi_reduction <add>, %235, %cst_117 [1] : vector<32x32xf32> to vector<32xf32>
    %237 = vector.shape_cast %236 : vector<32xf32> to vector<32x1xf32>
    %238 = tpu.reciprocal %237 {approx = true} : vector<32x1xf32> -> vector<32x1xf32>
    %239 = vector.broadcast %238 : vector<32x1xf32> to vector<32x32xf32>
    %240 = arith.mulf %235, %239 : vector<32x32xf32>
    %cst_118 = arith.constant dense<0.000000e+00> : vector<32x16xf32>
    %241 = tpu.matmul %240, %226, %cst_118 {dimension_numbers = #tpu.dot_dimension_numbers<[1], [0], [0], [1], [0, 0, 1, 1], [], []>} : vector<32x32xf32>, vector<32x16xf32>, vector<32x16xf32> -> vector<32x16xf32>
    %242 = vector.extract_strided_slice %201 {offsets = [16, 0], sizes = [16, 32], strides = [1, 1]} : vector<32x32xf32> to vector<16x32xf32>
    %cst_119 = arith.constant dense<0.000000e+00> : vector<32x32xf32>
    %243 = tpu.matmul %241, %242, %cst_119 {dimension_numbers = #tpu.dot_dimension_numbers<[1], [0], [0], [1], [0, 0, 1, 1], [], []>} : vector<32x16xf32>, vector<16x32xf32>, vector<32x32xf32> -> vector<32x32xf32>
    %244 = arith.addf %223, %243 : vector<32x32xf32>
    %245 = arith.addf %163, %244 : vector<32x32xf32>
    %c1_120 = arith.constant 1 : index
    %c0_121 = arith.constant 0 : index
    %c0_122 = arith.constant 0 : index
    %246 = vector.load %arg10[%c1_120, %c0_121, %c0_122] : memref<2x1x32xf32, #tpu.memory_space<vmem>>, vector<1x1x32xf32>
    %247 = vector.shape_cast %246 : vector<1x1x32xf32> to vector<1x32xf32>
    %248 = vector.broadcast %247 : vector<1x32xf32> to vector<32x32xf32>
    %249 = arith.addf %245, %248 : vector<32x32xf32>
    %c1_123 = arith.constant 1 : index
    %c0_124 = arith.constant 0 : index
    %c0_125 = arith.constant 0 : index
    %250 = vector.load %arg11[%c1_123, %c0_124, %c0_125] : memref<2x1x32xf32, #tpu.memory_space<vmem>>, vector<1x1x32xf32>
    %251 = vector.shape_cast %250 : vector<1x1x32xf32> to vector<1x32xf32>
    %c1_126 = arith.constant 1 : index
    %c0_127 = arith.constant 0 : index
    %c0_128 = arith.constant 0 : index
    %252 = vector.load %arg12[%c1_126, %c0_127, %c0_128] : memref<2x1x32xf32, #tpu.memory_space<vmem>>, vector<1x1x32xf32>
    %253 = vector.shape_cast %252 : vector<1x1x32xf32> to vector<1x32xf32>
    %cst_129 = arith.constant dense<0.000000e+00> : vector<32xf32>
    %254 = vector.multi_reduction <add>, %249, %cst_129 [1] : vector<32x32xf32> to vector<32xf32>
    %255 = vector.shape_cast %254 : vector<32xf32> to vector<32x1xf32>
    %cst_130 = arith.constant 3.200000e+01 : f32
    %256 = vector.broadcast %cst_130 : f32 to vector<32x1xf32>
    %257 = arith.divf %255, %256 : vector<32x1xf32>
    %258 = vector.broadcast %257 : vector<32x1xf32> to vector<32x32xf32>
    %259 = arith.subf %249, %258 : vector<32x32xf32>
    %260 = arith.mulf %259, %259 : vector<32x32xf32>
    %cst_131 = arith.constant dense<0.000000e+00> : vector<32xf32>
    %261 = vector.multi_reduction <add>, %260, %cst_131 [1] : vector<32x32xf32> to vector<32xf32>
    %262 = vector.shape_cast %261 : vector<32xf32> to vector<32x1xf32>
    %cst_132 = arith.constant 3.200000e+01 : f32
    %263 = vector.broadcast %cst_132 : f32 to vector<32x1xf32>
    %264 = arith.divf %262, %263 : vector<32x1xf32>
    %265 = vector.broadcast %257 : vector<32x1xf32> to vector<32x32xf32>
    %266 = arith.subf %249, %265 : vector<32x32xf32>
    %cst_133 = arith.constant 9.99999996E-13 : f32
    %267 = vector.broadcast %cst_133 : f32 to vector<32x1xf32>
    %268 = arith.addf %264, %267 : vector<32x1xf32>
    %269 = math.rsqrt %268 : vector<32x1xf32>
    %270 = vector.broadcast %269 : vector<32x1xf32> to vector<32x32xf32>
    %271 = arith.mulf %266, %270 : vector<32x32xf32>
    %272 = vector.broadcast %251 : vector<1x32xf32> to vector<32x32xf32>
    %273 = arith.mulf %271, %272 : vector<32x32xf32>
    %274 = vector.broadcast %253 : vector<1x32xf32> to vector<32x32xf32>
    %275 = arith.addf %273, %274 : vector<32x32xf32>
    %c1_134 = arith.constant 1 : index
    %c0_135 = arith.constant 0 : index
    %c0_136 = arith.constant 0 : index
    %276 = vector.load %arg13[%c1_134, %c0_135, %c0_136] : memref<2x32x128xf32, #tpu.memory_space<vmem>>, vector<1x32x128xf32>
    %277 = vector.shape_cast %276 : vector<1x32x128xf32> to vector<32x128xf32>
    %cst_137 = arith.constant dense<0.000000e+00> : vector<32x128xf32>
    %278 = tpu.matmul %275, %277, %cst_137 {dimension_numbers = #tpu.dot_dimension_numbers<[1], [0], [0], [1], [0, 0, 1, 1], [], []>} : vector<32x32xf32>, vector<32x128xf32>, vector<32x128xf32> -> vector<32x128xf32>
    %c1_138 = arith.constant 1 : index
    %c0_139 = arith.constant 0 : index
    %c0_140 = arith.constant 0 : index
    %279 = vector.load %arg14[%c1_138, %c0_139, %c0_140] : memref<2x1x128xf32, #tpu.memory_space<vmem>>, vector<1x1x128xf32>
    %280 = vector.shape_cast %279 : vector<1x1x128xf32> to vector<1x128xf32>
    %281 = vector.broadcast %280 : vector<1x128xf32> to vector<32x128xf32>
    %282 = arith.addf %278, %281 : vector<32x128xf32>
    %283 = arith.mulf %282, %282 : vector<32x128xf32>
    %284 = arith.mulf %282, %283 : vector<32x128xf32>
    %cst_141 = arith.constant 4.471500e-02 : f32
    %285 = vector.broadcast %cst_141 : f32 to vector<32x128xf32>
    %286 = arith.mulf %285, %284 : vector<32x128xf32>
    %287 = arith.addf %282, %286 : vector<32x128xf32>
    %cst_142 = arith.constant 0.797884583 : f32
    %288 = vector.broadcast %cst_142 : f32 to vector<32x128xf32>
    %289 = arith.mulf %288, %287 : vector<32x128xf32>
    %290 = math.tanh %289 : vector<32x128xf32>
    %cst_143 = arith.constant 1.000000e+00 : f32
    %291 = vector.broadcast %cst_143 : f32 to vector<32x128xf32>
    %292 = arith.addf %291, %290 : vector<32x128xf32>
    %cst_144 = arith.constant 5.000000e-01 : f32
    %293 = vector.broadcast %cst_144 : f32 to vector<32x128xf32>
    %294 = arith.mulf %293, %292 : vector<32x128xf32>
    %295 = arith.mulf %282, %294 : vector<32x128xf32>
    %c1_145 = arith.constant 1 : index
    %c0_146 = arith.constant 0 : index
    %c0_147 = arith.constant 0 : index
    %296 = vector.load %arg15[%c1_145, %c0_146, %c0_147] : memref<2x128x32xf32, #tpu.memory_space<vmem>>, vector<1x128x32xf32>
    %297 = vector.shape_cast %296 : vector<1x128x32xf32> to vector<128x32xf32>
    %cst_148 = arith.constant dense<0.000000e+00> : vector<32x32xf32>
    %298 = tpu.matmul %295, %297, %cst_148 {dimension_numbers = #tpu.dot_dimension_numbers<[1], [0], [0], [1], [0, 0, 1, 1], [], []>} : vector<32x128xf32>, vector<128x32xf32>, vector<32x32xf32> -> vector<32x32xf32>
    %299 = arith.addf %249, %298 : vector<32x32xf32>
    %c1_149 = arith.constant 1 : index
    %c0_150 = arith.constant 0 : index
    %c0_151 = arith.constant 0 : index
    %300 = vector.load %arg16[%c1_149, %c0_150, %c0_151] : memref<2x1x32xf32, #tpu.memory_space<vmem>>, vector<1x1x32xf32>
    %301 = vector.shape_cast %300 : vector<1x1x32xf32> to vector<1x32xf32>
    %302 = vector.broadcast %301 : vector<1x32xf32> to vector<32x32xf32>
    %303 = arith.addf %299, %302 : vector<32x32xf32>
    %c0_152 = arith.constant 0 : index
    %c0_153 = arith.constant 0 : index
    %304 = vector.load %arg17[%c0_152, %c0_153] : memref<1x32xf32, #tpu.memory_space<vmem>>, vector<1x32xf32>
    %c0_154 = arith.constant 0 : index
    %c0_155 = arith.constant 0 : index
    %305 = vector.load %arg18[%c0_154, %c0_155] : memref<1x32xf32, #tpu.memory_space<vmem>>, vector<1x32xf32>
    %cst_156 = arith.constant dense<0.000000e+00> : vector<32xf32>
    %306 = vector.multi_reduction <add>, %303, %cst_156 [1] : vector<32x32xf32> to vector<32xf32>
    %307 = vector.shape_cast %306 : vector<32xf32> to vector<32x1xf32>
    %cst_157 = arith.constant 3.200000e+01 : f32
    %308 = vector.broadcast %cst_157 : f32 to vector<32x1xf32>
    %309 = arith.divf %307, %308 : vector<32x1xf32>
    %310 = vector.broadcast %309 : vector<32x1xf32> to vector<32x32xf32>
    %311 = arith.subf %303, %310 : vector<32x32xf32>
    %312 = arith.mulf %311, %311 : vector<32x32xf32>
    %cst_158 = arith.constant dense<0.000000e+00> : vector<32xf32>
    %313 = vector.multi_reduction <add>, %312, %cst_158 [1] : vector<32x32xf32> to vector<32xf32>
    %314 = vector.shape_cast %313 : vector<32xf32> to vector<32x1xf32>
    %cst_159 = arith.constant 3.200000e+01 : f32
    %315 = vector.broadcast %cst_159 : f32 to vector<32x1xf32>
    %316 = arith.divf %314, %315 : vector<32x1xf32>
    %317 = vector.broadcast %309 : vector<32x1xf32> to vector<32x32xf32>
    %318 = arith.subf %303, %317 : vector<32x32xf32>
    %cst_160 = arith.constant 9.99999996E-13 : f32
    %319 = vector.broadcast %cst_160 : f32 to vector<32x1xf32>
    %320 = arith.addf %316, %319 : vector<32x1xf32>
    %321 = math.rsqrt %320 : vector<32x1xf32>
    %322 = vector.broadcast %321 : vector<32x1xf32> to vector<32x32xf32>
    %323 = arith.mulf %318, %322 : vector<32x32xf32>
    %324 = vector.broadcast %304 : vector<1x32xf32> to vector<32x32xf32>
    %325 = arith.mulf %323, %324 : vector<32x32xf32>
    %326 = vector.broadcast %305 : vector<1x32xf32> to vector<32x32xf32>
    %327 = arith.addf %325, %326 : vector<32x32xf32>
    %328 = vector.extract_strided_slice %327 {offsets = [0, 0], sizes = [8, 32], strides = [1, 1]} : vector<32x32xf32> to vector<8x32xf32>
    %329 = vector.extract_strided_slice %327 {offsets = [8, 0], sizes = [8, 32], strides = [1, 1]} : vector<32x32xf32> to vector<8x32xf32>
    %330 = vector.extract_strided_slice %327 {offsets = [16, 0], sizes = [8, 32], strides = [1, 1]} : vector<32x32xf32> to vector<8x32xf32>
    %331 = vector.extract_strided_slice %327 {offsets = [24, 0], sizes = [8, 32], strides = [1, 1]} : vector<32x32xf32> to vector<8x32xf32>
    %332 = tpu.concatenate %328, %329, %330, %331 in 1 : vector<8x32xf32>, vector<8x32xf32>, vector<8x32xf32>, vector<8x32xf32> -> vector<8x128xf32>
    %c0_161 = arith.constant 0 : index
    %c0_162 = arith.constant 0 : index
    %333 = vector.load %arg19[%c0_161, %c0_162] : memref<8x128xf32, #tpu.memory_space<vmem>>, vector<8x128xf32>
    tpu.vector_store %arg19[%c0_161, %c0_162], %332 {strides = array<i32>} : memref<8x128xf32, #tpu.memory_space<vmem>>, vector<8x128xf32>,
    return
  }
}

</mosaic_0001>

<bundles_post_ra>
// kernel: wav_audio_deit.1
= control target key start
LH: loop header
LB: loop body
LE: loop exit
PB: predicated region body
PF: predicated region fallthrough
CT: control target
= control target key end

     0   :  { %s3391_s0 = inlined_call_operand.vmem [shape: f32[8,128], index: 0, kind: input, shape index: {}]   ;;  %s3392_s1 = inlined_call_operand.vmem [shape: f32[128,128], index: 1, kind: input, shape index: {}]   ;;  %s3393_s2 = inlined_call_operand.vmem [shape: f32[4,64,32], index: 2, kind: input, shape index: {}]   ;;  %s3394_s3 = inlined_call_operand.vmem [shape: f32[32,32], index: 3, kind: input, shape index: {}]   ;;  %s3395_s4 = inlined_call_operand.vmem [shape: f32[32,32], index: 4, kind: input, shape index: {}]   ;;  %s3396_s5 = inlined_call_operand.vmem [shape: f32[2,1,32], index: 5, kind: input, shape index: {}]   ;;  %s3397_s6 = inlined_call_operand.vmem [shape: f32[2,1,32], index: 6, kind: input, shape index: {}]   ;;  %s3398_s7 = inlined_call_operand.vmem [shape: f32[2,32,96], index: 7, kind: input, shape index: {}]   ;;  %s3399_s8 = inlined_call_operand.vmem [shape: f32[2,1,96], index: 8, kind: input, shape index: {}]   ;;  %s3400_s9 = inlined_call_operand.vmem [shape: f32[2,32,32], index: 9, kind: input, shape index: {}]   ;;  %s3401_s10 = inlined_call_operand.vmem [shape: f32[2,1,32], index: 10, kind: input, shape index: {}]   ;;  %s3402_s11 = inlined_call_operand.vmem [shape: f32[2,1,32], index: 11, kind: input, shape index: {}]   ;;  %s3403_s12 = inlined_call_operand.vmem [shape: f32[2,1,32], index: 12, kind: input, shape index: {}]   ;;  %s3404_s13 = inlined_call_operand.vmem [shape: f32[2,32,128], index: 13, kind: input, shape index: {}]   ;;  %s3405_s14 = inlined_call_operand.vmem [shape: f32[2,1,128], index: 14, kind: input, shape index: {}]   ;;  %s3406_s15 = inlined_call_operand.vmem [shape: f32[2,128,32], index: 15, kind: input, shape index: {}]   ;;  %s3407_s16 = inlined_call_operand.vmem [shape: f32[2,1,32], index: 16, kind: input, shape index: {}]   ;;  %s3408_s17 = inlined_call_operand.vmem [shape: f32[1,32], index: 17, kind: input, shape index: {}]   ;;  %s3409_s18 = inlined_call_operand.vmem [shape: f32[1,32], index: 18, kind: input, shape index: {}]   ;;  %s3410_s19 = inlined_call_operand.hbm [shape: f32[8,128], index: 19, kind: output, shape index: {}]  }
   0x1   :  { %3414 = sst [smem:[#allocation5_spill]] %s3391_s0 }
   0x2   :  { %3415 = sst [smem:[#allocation6_spill]] %s3392_s1 }
   0x3   :  { %3416 = sst [smem:[#allocation7_spill]] %s3393_s2 }
   0x4   :  { %3417 = sst [smem:[#allocation8_spill]] %s3394_s3 }
   0x5   :  { %s3418_s20 = sld [smem:[#allocation6_spill]] }
   0xb   :  { %v79_v0 = vld [vmem:[%s3418_s20 + $0x78] sm:$0xff]  ;;  %v78_v1 = vld [vmem:[%s3418_s20 + $0x70] sm:$0xff]  ;;  %v77_v2 = vld [vmem:[%s3418_s20 + $0x68] sm:$0xff] }
   0xc   :  { %80 = vmatpush.msra.mxu0 %v79_v0  ;;  %v76_v3 = vld [vmem:[%s3418_s20 + $0x60] sm:$0xff]  ;;  %v75_v4 = vld [vmem:[%s3418_s20 + $0x58] sm:$0xff]  ;;  %v74_v5 = vld [vmem:[%s3418_s20 + $0x50] sm:$0xff] }
   0xd   :  { %v73_v6 = vld [vmem:[%s3418_s20 + $0x48] sm:$0xff] }
   0xe   :  { %81 = vmatpush.msra.mxu0 %v78_v1 }
  0x10   :  { %82 = vmatpush.msra.mxu0 %v77_v2 }
  0x12   :  { %83 = vmatpush.msra.mxu0 %v76_v3 }
  0x14   :  { %84 = vmatpush.msra.mxu0 %v75_v4 }
  0x16   :  { %85 = vmatpush.msra.mxu0 %v74_v5 }
  0x17   :  { %24 = vsyncpa [#allocation3], 0  ;;  %v72_v7 = vld [vmem:[%s3418_s20 + $0x40] sm:$0xff]  ;;  %v71_v8 = vld [vmem:[%s3418_s20 + $0x38] sm:$0xff]  ;;  %s3419_s23 = sld [smem:[#allocation5_spill]]  ;;  %s2407_s30 = smov 64  }
  0x18   :  { %86 = vmatpush.msra.mxu0 %v73_v6  ;;  %v70_v9 = vld [vmem:[%s3418_s20 + $0x30] sm:$0xff]  ;;  %v69_v10 = vld [vmem:[%s3418_s20 + $0x28] sm:$0xff]  ;;  %v68_v11 = vld [vmem:[%s3418_s20 + $0x20] sm:$0xff]  ;;  %s3420_s3 = sld [smem:[#allocation7_spill]]  ;;  %vm114_vm0 = vcmask 523264   ;;  %vm239_vm1 = vcmask 261120  }
  0x19   :  { %v67_v12 = vld [vmem:[%s3418_s20 + $0x18] sm:$0xff]  ;;  %v66_v13 = vld [vmem:[%s3418_s20 + $0x10] sm:$0xff]  ;;  %v65_v14 = vld [vmem:[%s3418_s20 + $0x8] sm:$0xff]  ;;  %s3421_s2 = sld [smem:[#allocation8_spill]]  ;;  %v2408_v5 = vmov 32.0   ;;  %s2409_s28 = smov 80  }
  0x1a   :  { %87 = vmatpush.msra.mxu0 %v72_v7  ;;  %v64_v15 = vld [vmem:[%s3418_s20] sm:$0xff]  ;;  %2255 = vrcp.f32 %v2408_v5  ;;  %s2410_s29 = smov 96   ;;  %s2411_s20 = smov 112   ;;  %vm414_vm15 = vcmask 130048  }
  0x1b   :  { %s2412_s25 = smov 48   ;;  %s2036_s26 = sshll.u32 %s3410_s19, 4  ;;  %s2037_s26 = int_to_ptr.hbm [resolvable:$true] %s2036_s26 }
  0x1c   :  { %88 = vmatpush.msra.mxu0 %v71_v8 }
  0x1d   :  { %v63_v16 = vld [vmem:[%s3419_s23] sm:$0xff] }
  0x1e   :  { %89 = vmatpush.msra.mxu0 %v70_v9  ;;  %v113_v17 = vld [vmem:[%s3420_s3 + $0x38] sm:$0xff]  ;;  %v112_v18 = vld [vmem:[%s3420_s3 + $0x30] sm:$0xff]  ;;  %v111_v21 = vld [vmem:[%s3420_s3 + $0x28] sm:$0xff] }
  0x1f   :  { %126 = vmatpush.msra.mxu1 %v113_v17  ;;  %v2053_v19 = vld [vmem:[%s3420_s3 + $0x78] sm:$0xff]  ;;  %v2052_v22 = vld [vmem:[%s3420_s3 + $0x70] sm:$0xff]  ;;  %v2051_v24 = vld [vmem:[%s3420_s3 + $0x68] sm:$0xff] }
  0x20   :  { %90 = vmatpush.msra.mxu0 %v69_v10  ;;  %v2062_v20 = vld [vmem:[%s3420_s3 + $0xb8] sm:$0xff]  ;;  %155 = vmatpush.msra.mxu2 %v2053_v19  ;;  %v2061_v23 = vld [vmem:[%s3420_s3 + $0xb0] sm:$0xff]  ;;  %v2060_v25 = vld [vmem:[%s3420_s3 + $0xa8] sm:$0xff]  ;;  %v2256_v6 = vpop.eup %2255 }
  0x21   :  { %127 = vmatpush.msra.mxu1 %v112_v18  ;;  %v110_v26 = vld [vmem:[%s3420_s3 + $0x20] sm:$0xff]  ;;  %v109_v29 = vld [vmem:[%s3420_s3 + $0x18] sm:$0xff]  ;;  %v108_v32 = vld [vmem:[%s3420_s3 + $0x10] sm:$0xff]  ;;  %v253_v7 = vmul.f32 32.0, %v2256_v6  ;;  %vm257_vm2 = vweird.f32 %v2256_v6 }
  0x22   :  { %91 = vmatpush.msra.mxu0 %v68_v11  ;;  %156 = vmatpush.msra.mxu2 %v2052_v22  ;;  %v2050_v27 = vld [vmem:[%s3420_s3 + $0x60] sm:$0xff]  ;;  %v2049_v30 = vld [vmem:[%s3420_s3 + $0x58] sm:$0xff]  ;;  %v2048_v33 = vld [vmem:[%s3420_s3 + $0x50] sm:$0xff] }
  0x23   :  { %128 = vmatpush.msra.mxu1 %v111_v21  ;;  %v2059_v28 = vld [vmem:[%s3420_s3 + $0xa0] sm:$0xff]  ;;  %v2058_v31 = vld [vmem:[%s3420_s3 + $0x98] sm:$0xff]  ;;  %v2057_v34 = vld [vmem:[%s3420_s3 + $0x90] sm:$0xff]  ;;  %v254_v8 = vsub.f32 1.0, %v253_v7 }
  0x24   :  { %92 = vmatpush.msra.mxu0 %v67_v12  ;;  %157 = vmatpush.msra.mxu2 %v2051_v24  ;;  %v107_v35 = vld [vmem:[%s3420_s3 + $0x8] sm:$0xff]  ;;  %v106_v38 = vld [vmem:[%s3420_s3] sm:$0xff]  ;;  %v2071_v39 = vld [vmem:[%s3420_s3 + $0xf8] sm:$0xff] }
  0x25   :  { %129 = vmatpush.msra.mxu1 %v110_v26  ;;  %v2047_v36 = vld [vmem:[%s3420_s3 + $0x48] sm:$0xff]  ;;  %v2070_v40 = vld [vmem:[%s3420_s3 + $0xf0] sm:$0xff]  ;;  %v2046_v44 = vld [vmem:[%s3420_s3 + $0x40] sm:$0xff]  ;;  %v255_v9 = vmul.f32 %v2256_v6, %v254_v8 }
  0x26   :  { %93 = vmatpush.msra.mxu0 %v66_v13  ;;  %158 = vmatpush.msra.mxu2 %v2050_v27  ;;  %v2056_v37 = vld [vmem:[%s3420_s3 + $0x88] sm:$0xff]  ;;  %v2055_v45 = vld [vmem:[%s3420_s3 + $0x80] sm:$0xff]  ;;  %v2067_v47 = vld [vmem:[%s3420_s3 + $0xd8] sm:$0xff] }
  0x27   :  { %130 = vmatpush.msra.mxu1 %v109_v29  ;;  %v2069_v41 = vld [vmem:[%s3420_s3 + $0xe8] sm:$0xff]  ;;  %v2068_v46 = vld [vmem:[%s3420_s3 + $0xe0] sm:$0xff]  ;;  %v2066_v48 = vld [vmem:[%s3420_s3 + $0xd0] sm:$0xff]  ;;  %v256_v10 = vadd.f32 %v2256_v6, %v255_v9 }
  0x28   :  { %94 = vmatpush.msra.mxu0 %v65_v14  ;;  %159 = vmatpush.msra.mxu2 %v2049_v30  ;;  %v2065_v49 = vld [vmem:[%s3420_s3 + $0xc8] sm:$0xff]  ;;  %v2064_v50 = vld [vmem:[%s3420_s3 + $0xc0] sm:$0xff]  ;;  %v228_v59 = vld [vmem:[%s3421_s2 + $0x18] sm:$0xff] }
  0x29   :  { %131 = vmatpush.msra.mxu1 %v108_v32  ;;  %v225_v53 = vld [vmem:[%s3421_s2] sm:$0xff]  ;;  %v226_v57 = vld [vmem:[%s3421_s2 + $0x8] sm:$0xff]  ;;  %v227_v1 = vld [vmem:[%s3421_s2 + $0x10] sm:$0xff]  ;;  %v2695_v11 = vsel %vm257_vm2, %v2256_v6, %v256_v10 }
  0x2a   :  { %95 = vmatpush.msra.mxu0 %v64_v15  ;;  %160 = vmatpush.msra.mxu2 %v2048_v33  ;;  %v352_v32 = vld [vmem:[%s3398_s7 + $0x18] sm:$0xff]  ;;  %v351_v33 = vld [vmem:[%s3398_s7 + $0x10] sm:$0xff] }
  0x2b   :  { %96 = vmatmul.f32.vlgmr.msra.gmra.mxu0 %v63_v16  ;;  %132 = vmatpush.msra.mxu1 %v107_v35  ;;  %v349_v35 = vld [vmem:[%s3398_s7] sm:$0xff] }
  0x2c   :  { %184 = vmatpush.msrb.mxu0 %v2062_v20  ;;  %161 = vmatpush.msra.mxu2 %v2047_v36 }
  0x2d   :  { %133 = vmatpush.msra.mxu1 %v106_v38 }
  0x2e   :  { %185 = vmatpush.msrb.mxu0 %v2061_v23  ;;  %162 = vmatpush.msra.mxu2 %v2046_v44 }
  0x2f   :  { %213 = vmatpush.msrb.mxu1 %v2071_v39 }
  0x30   :  { %186 = vmatpush.msrb.mxu0 %v2060_v25  ;;  %381 = vmatpush.msrb.mxu2 %v352_v32 }
  0x31   :  { %214 = vmatpush.msrb.mxu1 %v2070_v40 }
  0x32   :  { %187 = vmatpush.msrb.mxu0 %v2059_v28  ;;  %382 = vmatpush.msrb.mxu2 %v351_v33 }
  0x33   :  { %215 = vmatpush.msrb.mxu1 %v2069_v41 }
  0x34   :  { %188 = vmatpush.msrb.mxu0 %v2058_v31 }
  0x35   :  { %216 = vmatpush.msrb.mxu1 %v2068_v46 }
  0x36   :  { %189 = vmatpush.msrb.mxu0 %v2057_v34  ;;  %v350_v34 = vld [vmem:[%s3398_s7 + $0x8] sm:$0xff] }
  0x37   :  { %217 = vmatpush.msrb.mxu1 %v2067_v47  ;;  %383 = vmatpush.msrb.mxu2 %v350_v34  ;;  %v2239_v34 = vld [vmem:[%s3399_s8] ss:$0 sm:$0xff] }
  0x38   :  { %190 = vmatpush.msrb.mxu0 %v2056_v37 }
  0x39   :  { %218 = vmatpush.msrb.mxu1 %v2066_v48  ;;  %384 = vmatpush.msrb.mxu2 %v349_v35 }
  0x3a   :  { %191 = vmatpush.msrb.mxu0 %v2055_v45 }
  0x3b   :  { %219 = vmatpush.msrb.mxu1 %v2065_v49 }
  0x3d   :  { %220 = vmatpush.msrb.mxu1 %v2064_v50 }
  0xa8   :  { %v97_v42 = vpop.f32.mrf.mxu0 }
  0xa9   :  { %v100_v43 = vmul.f32 %v97_v42, %v97_v42 }
  0xab   :  { %102 = vrot.lane.b32.xlu0 %v100_v43, %s2407_s30 }
 0x11d   :  { %v103_v51 = vpop.permute.xlu0 %102 }
 0x11e   :  { %v105_v52 = vadd.f32 %v103_v51, %v100_v43 }
 0x120   :  { %2045 = vmatmul.msk.f32.vlgmr.msra.gmra.mxu1 %vm114_vm0, %v105_v52  ;;  %2054 = vmatmul.msk.f32.vlgmr.msra.gmra.mxu2 %vm114_vm0, %v105_v52 }
 0x121   :  { %2063 = vmatmul.msk.f32.vlgmr.msrb.gmra.mxu0 %vm114_vm0, %v105_v52 }
 0x128   :  { %2072 = vmatmul.msk.f32.vlgmr.msrb.gmra.mxu1 %vm114_vm0, %v105_v52 }
 0x19d   :  { %v135_v54 = vpop.f32.mrf.mxu1 }
 0x19e   :  { %v2670_v55 = vadd.f32 %v225_v53, %v135_v54  ;;  %v193_v0 = vpop.f32.mrf.mxu0 }
 0x19f   :  { %v2691_v3 = vadd.f32 %v227_v1, %v193_v0  ;;  %v2238_v0 = vld [vmem:[%s3397_s6] ss:$0 sm:$0xff] }
 0x1a0   :  { %v240_v56 = vsel %vm239_vm1, %v2670_v55, 0.0 }
 0x1a1   :  { %241 = vadd.xlane.f32.xlu0 %v240_v56  ;;  %v246_v4 = vsel %vm239_vm1, %v2691_v3, 0.0 }
 0x1a3   :  { %v164_v58 = vpop.f32.mrf.mxu2 }
 0x1a4   :  { %v2680_v60 = vadd.f32 %v226_v57, %v164_v58  ;;  %v2237_v58 = vld [vmem:[%s3396_s5] ss:$0 sm:$0xff] }
 0x1a5   :  { %v222_v61 = vpop.f32.mrf.mxu1 }
 0x1a6   :  { %v2682_v62 = vadd.f32 %v228_v59, %v222_v61  ;;  %v243_v63 = vsel %vm239_vm1, %v2680_v60, 0.0 }
 0x1a7   :  { %244 = vadd.xlane.f32.xlu1 %v243_v63 }
 0x1a8   :  { %v249_v2 = vsel %vm239_vm1, %v2682_v62, 0.0 }
 0x1a9   :  { %250 = vadd.xlane.f32.xlu2 %v249_v2 }
 0x1af   :  { %247 = vadd.xlane.f32.xlu1 %v246_v4 }
 0x214   :  { %v242_v12 = vpop.xlane.xlu0 %241 }
 0x215   :  { %v259_v13 = vmul.f32 %v2695_v11, %v242_v12 }
 0x217   :  { %v263_v14 = vsub.f32 %v2670_v55, %v259_v13 }
 0x219   :  { %v267_v15 = vmul.f32 %v263_v14, %v263_v14 }
 0x21a   :  { %v245_v16 = vpop.xlane.xlu1 %244 }
 0x21b   :  { %v260_v17 = vmul.f32 %v2695_v11, %v245_v16  ;;  %v271_v18 = vsel %vm239_vm1, %v267_v15, 0.0 }
 0x21c   :  { %272 = vadd.xlane.f32.xlu2 %v271_v18  ;;  %v251_v19 = vpop.xlane.xlu2 %250 }
 0x21d   :  { %v2702_v20 = vsub.f32 %v2680_v60, %v260_v17  ;;  %v262_v21 = vmul.f32 %v2695_v11, %v251_v19 }
 0x21f   :  { %v268_v22 = vmul.f32 %v2702_v20, %v2702_v20  ;;  %v2708_v23 = vsub.f32 %v2682_v62, %v262_v21 }
 0x221   :  { %v274_v24 = vsel %vm239_vm1, %v268_v22, 0.0  ;;  %v270_v28 = vmul.f32 %v2708_v23, %v2708_v23 }
 0x222   :  { %275 = vadd.xlane.f32.xlu1 %v274_v24  ;;  %v248_v25 = vpop.xlane.xlu1 %247 }
 0x223   :  { %v261_v26 = vmul.f32 %v2695_v11, %v248_v25  ;;  %v280_v31 = vsel %vm239_vm1, %v270_v28, 0.0 }
 0x225   :  { %v2713_v27 = vsub.f32 %v2691_v3, %v261_v26 }
 0x227   :  { %v269_v29 = vmul.f32 %v2713_v27, %v2713_v27 }
 0x229   :  { %v277_v30 = vsel %vm239_vm1, %v269_v29, 0.0 }
 0x22a   :  { %278 = vadd.xlane.f32.xlu2 %v277_v30  ;;  %281 = vadd.xlane.f32.xlu1 %v280_v31 }
 0x28f   :  { %v273_v36 = vpop.xlane.xlu2 %272 }
 0x290   :  { %v283_v37 = vmul.f32 %v273_v36, %v2695_v11 }
 0x292   :  { %v287_v38 = vadd.f32 1e-12, %v283_v37 }
 0x294   :  { %2257 = vrsqrt.f32 %v287_v38  ;;  %vm297_vm4 = vweird.f32 %v287_v38 }
 0x295   :  { %v276_v39 = vpop.xlane.xlu1 %275 }
 0x296   :  { %v284_v40 = vmul.f32 %v276_v39, %v2695_v11 }
 0x298   :  { %v288_v41 = vadd.f32 1e-12, %v284_v40 }
 0x29a   :  { %v2258_v42 = vpop.eup %2257  ;;  %2259 = vrsqrt.f32 %v288_v41  ;;  %vm307_vm7 = vweird.f32 %v288_v41 }
 0x29b   :  { %v292_v43 = vmul.f32 %v2258_v42, %v287_v38  ;;  %vm298_vm3 = vweird.f32 %v2258_v42 }
 0x29c   :  { %vm299_vm5 = vmor %vm297_vm4, %vm298_vm3 }
 0x29d   :  { %v293_v44 = vmul.f32 %v2258_v42, %v292_v43  ;;  %v282_v45 = vpop.xlane.xlu1 %281  ;;  %v279_v46 = vpop.xlane.xlu2 %278 }
 0x29e   :  { %v286_v47 = vmul.f32 %v282_v45, %v2695_v11  ;;  %v285_v48 = vmul.f32 %v279_v46, %v2695_v11 }
 0x29f   :  { %v294_v49 = vmul.f32 0.5, %v293_v44 }
 0x2a0   :  { %v2260_v50 = vpop.eup %2259  ;;  %v290_v51 = vadd.f32 1e-12, %v286_v47  ;;  %v289_v52 = vadd.f32 1e-12, %v285_v48 }
 0x2a1   :  { %v295_v53 = vsub.f32 1.5, %v294_v49  ;;  %v302_v54 = vmul.f32 %v2260_v50, %v288_v41  ;;  %vm308_vm6 = vweird.f32 %v2260_v50 }
 0x2a2   :  { %2261 = vrsqrt.f32 %v290_v51  ;;  %vm309_vm8 = vmor %vm307_vm7, %vm308_vm6  ;;  %vm317_vm10 = vweird.f32 %v289_v52  ;;  %vm327_vm13 = vweird.f32 %v290_v51 }
 0x2a3   :  { %v296_v56 = vmul.f32 %v2258_v42, %v295_v53  ;;  %v303_v57 = vmul.f32 %v2260_v50, %v302_v54  ;;  %2263 = vrsqrt.f32 %v289_v52  ;;  %v233_v53 = vld [vmem:[%s3395_s4] sm:$0xff] }
 0x2a5   :  { %v300_v59 = vsel %vm299_vm5, %v2258_v42, %v296_v56  ;;  %v304_v61 = vmul.f32 0.5, %v303_v57 }
 0x2a6   :  { %v331_v63 = vmul.f32 %v300_v59, %v263_v14 }
 0x2a7   :  { %v305_v1 = vsub.f32 1.5, %v304_v61 }
 0x2a8   :  { %v2262_v2 = vpop.eup %2261  ;;  %v338_v4 = vmul.f32 %v2237_v58, %v331_v63 }
 0x2a9   :  { %v2264_v5 = vpop.eup %2263  ;;  %v306_v6 = vmul.f32 %v2260_v50, %v305_v1  ;;  %v322_v7 = vmul.f32 %v2262_v2, %v290_v51  ;;  %vm328_vm11 = vweird.f32 %v2262_v2 }
 0x2aa   :  { %v312_v8 = vmul.f32 %v2264_v5, %v289_v52  ;;  %v345_v9 = vadd.f32 %v2238_v0, %v338_v4  ;;  %vm318_vm9 = vweird.f32 %v2264_v5  ;;  %vm329_vm14 = vmor %vm327_vm13, %vm328_vm11  ;;  %v234_v4 = vld [vmem:[%s3395_s4 + $0x8] sm:$0xff] }
 0x2ab   :  { %v310_v10 = vsel %vm309_vm8, %v2260_v50, %v306_v6  ;;  %v323_v12 = vmul.f32 %v2262_v2, %v322_v7  ;;  %vm319_vm12 = vmor %vm317_vm10, %vm318_vm9 }
 0x2ac   :  { %v313_v13 = vmul.f32 %v2264_v5, %v312_v8  ;;  %2073 = vmatmul.msk.f32.vlgmr.msrb.gmra.mxu2 %vm239_vm1, %v345_v9  ;;  %v332_v14 = vmul.f32 %v310_v10, %v2702_v20 }
 0x2ad   :  { %v324_v15 = vmul.f32 0.5, %v323_v12 }
 0x2ae   :  { %v314_v16 = vmul.f32 0.5, %v313_v13  ;;  %v339_v17 = vmul.f32 %v2237_v58, %v332_v14  ;;  %v235_v13 = vld [vmem:[%s3395_s4 + $0x10] sm:$0xff] }
 0x2af   :  { %v325_v18 = vsub.f32 1.5, %v324_v15 }
 0x2b0   :  { %v315_v19 = vsub.f32 1.5, %v314_v16  ;;  %v346_v22 = vadd.f32 %v2238_v0, %v339_v17 }
 0x2b1   :  { %v326_v24 = vmul.f32 %v2262_v2, %v325_v18 }
 0x2b2   :  { %v316_v21 = vmul.f32 %v2264_v5, %v315_v19 }
 0x2b3   :  { %v330_v20 = vsel %vm329_vm14, %v2262_v2, %v326_v24 }
 0x2b4   :  { %v320_v25 = vsel %vm319_vm12, %v2264_v5, %v316_v21  ;;  %2074 = vmatmul.msk.f32.gmra.mxu2 %vm239_vm1, %v346_v22  ;;  %v334_v30 = vmul.f32 %v330_v20, %v2708_v23  ;;  %v236_v22 = vld [vmem:[%s3395_s4 + $0x18] sm:$0xff] }
 0x2b5   :  { %v333_v26 = vmul.f32 %v320_v25, %v2713_v27 }
 0x2b6   :  { %v341_v31 = vmul.f32 %v2237_v58, %v334_v30 }
 0x2b7   :  { %v340_v28 = vmul.f32 %v2237_v58, %v333_v26 }
 0x2b8   :  { %v348_v32 = vadd.f32 %v2238_v0, %v341_v31 }
 0x2b9   :  { %v347_v29 = vadd.f32 %v2238_v0, %v340_v28 }
 0x2bc   :  { %2075 = vmatmul.msk.f32.gmra.mxu2 %vm239_vm1, %v347_v29 }
 0x2c4   :  { %2076 = vmatmul.msk.f32.gmra.mxu2 %vm239_vm1, %v348_v32 }
 0x32f   :  { %v386_v33 = vpop.f32.mrf.mxu2 }
 0x330   :  { %v2757_v23 = vadd.f32 %v2239_v34, %v386_v33 }
 0x337   :  { %v389_v35 = vpop.f32.mrf.mxu2 }
 0x338   :  { %v2753_v36 = vadd.f32 %v2239_v34, %v389_v35 }
 0x33a   :  { %575 = vrot.lane.b32.xlu0 %v2753_v36, %s2409_s28  ;;  %v2202_v20 = vpack.i.bf16 %v2757_v23, %v2753_v36 }
 0x33f   :  { %v392_v27 = vpop.f32.mrf.mxu2 }
 0x340   :  { %v2759_v37 = vadd.f32 %v2239_v34, %v392_v27 }
 0x342   :  { %406 = vrot.lane.b32.xlu0 %v2757_v23, %s2410_s29  ;;  %410 = vrot.lane.b32.xlu2 %v2759_v37, %s2410_s29 }
 0x343   :  { %577 = vrot.lane.b32.xlu1 %v2759_v37, %s2409_s28 }
 0x347   :  { %v395_v38 = vpop.f32.mrf.mxu2 }
 0x348   :  { %v2767_v39 = vadd.f32 %v2239_v34, %v395_v38 }
 0x34a   :  { %571 = vrot.lane.b32.xlu0 %v2767_v39, %s2411_s20  ;;  %579 = vrot.lane.b32.xlu2 %v2767_v39, %s2409_s28  ;;  %v2197_v28 = vpack.i.bf16 %v2759_v37, %v2767_v39 }
 0x34b   :  { %573 = vrot.lane.b32.xlu1 %v2757_v23, %s2409_s28 }
 0x352   :  { %412 = vrot.lane.b32.xlu2 %v2767_v39, %s2410_s29 }
 0x353   :  { %565 = vrot.lane.b32.xlu1 %v2757_v23, %s2411_s20 }
 0x35a   :  { %408 = vrot.lane.b32.xlu2 %v2753_v36, %s2410_s29 }
 0x35b   :  { %569 = vrot.lane.b32.xlu1 %v2759_v37, %s2411_s20 }
 0x362   :  { %567 = vrot.lane.b32.xlu2 %v2753_v36, %s2411_s20 }
 0x39c   :  { %v411_v40 = vpop.permute.xlu2 %410 }
 0x3a4   :  { %v580_v41 = vpop.permute.xlu2 %579 }
 0x3a5   :  { %2089 = vmatpush.xpose.msk.msra.mxu1 %vm414_vm15, %v580_v41 }
 0x3ac   :  { %v413_v42 = vpop.permute.xlu2 %412  ;;  %v576_v43 = vpop.permute.xlu0 %575 }
 0x3ad   :  { %2077 = vmatpush.xpose.msk.msra.mxu3 %vm414_vm15, %v413_v42 }
 0x3b1   :  { %2078 = vmatpush.xpose.msk.msra.mxu3 %vm414_vm15, %v411_v40 }
 0x3b4   :  { %v409_v44 = vpop.permute.xlu2 %408  ;;  %v407_v46 = vpop.permute.xlu0 %406 }
 0x3b5   :  { %v578_v45 = vpop.permute.xlu1 %577  ;;  %2079 = vmatpush.xpose.msk.msra.mxu3 %vm414_vm15, %v409_v44 }
 0x3b6   :  { %2090 = vmatpush.xpose.msk.msra.mxu1 %vm414_vm15, %v578_v45 }
 0x3b9   :  { %2080 = vmatpush.xpose.msk.msra.mxu3 %vm414_vm15, %v407_v46 }
 0x3ba   :  { %2091 = vmatpush.xpose.msk.msra.mxu1 %vm414_vm15, %v576_v43 }
 0x3bc   :  { %2081 = vmatmul.msk.f32.vlgmr.msra.gmra.mxu3 %vm414_vm15, %v2757_v23  ;;  %v568_v49 = vpop.permute.xlu2 %567  ;;  %v572_v51 = vpop.permute.xlu0 %571 }
 0x3bd   :  { %v574_v47 = vpop.permute.xlu1 %573 }
 0x3be   :  { %2092 = vmatpush.xpose.msk.msra.mxu1 %vm414_vm15, %v574_v47 }
 0x3c4   :  { %2082 = vmatmul.msk.f32.gmra.mxu3 %vm414_vm15, %v2753_v36 }
 0x3c5   :  { %v566_v48 = vpop.permute.xlu1 %565 }
 0x3c6   :  { %2093 = vmatmul.msk.f32.vlgmr.msra.gmra.mxu1 %vm414_vm15, %v566_v48 }
 0x3cc   :  { %2083 = vmatmul.msk.f32.gmra.mxu3 %vm414_vm15, %v2759_v37 }
 0x3cd   :  { %v570_v50 = vpop.permute.xlu1 %569 }
 0x3ce   :  { %2094 = vmatmul.msk.f32.gmra.mxu1 %vm414_vm15, %v568_v49 }
 0x3d4   :  { %2084 = vmatmul.msk.f32.gmra.mxu3 %vm414_vm15, %v2767_v39 }
 0x3d6   :  { %2095 = vmatmul.msk.f32.gmra.mxu1 %vm414_vm15, %v570_v50 }
 0x3de   :  { %2096 = vmatmul.msk.f32.gmra.mxu1 %vm414_vm15, %v572_v51 }
 0x43f   :  { %v448_v52 = vpop.f32.mrf.mxu3 }
 0x440   :  { %v460_v54 = vmul.f32 0.25, %v448_v52 }
 0x442   :  { %v464_v56 = vadd.f32 %v460_v54, %v233_v53 }
 0x443   :  { %v614_v57 = vpop.f32.mrf.mxu1 }
 0x444   :  { %v626_v58 = vmul.f32 0.25, %v614_v57  ;;  %v468_v59 = vsel %vm239_vm1, %v464_v56, -inf }
 0x445   :  { %469 = vmax.xlane.f32.xlu0 %v468_v59 }
 0x446   :  { %v630_v61 = vadd.f32 %v626_v58, %v233_v53 }
 0x447   :  { %v451_v0 = vpop.f32.mrf.mxu3 }
 0x448   :  { %v634_v63 = vsel %vm239_vm1, %v630_v61, -inf  ;;  %v461_v6 = vmul.f32 0.25, %v451_v0 }
 0x449   :  { %635 = vmax.xlane.f32.xlu2 %v634_v63 }
 0x44a   :  { %v465_v10 = vadd.f32 %v461_v6, %v234_v4 }
 0x44b   :  { %v617_v1 = vpop.f32.mrf.mxu1 }
 0x44c   :  { %v627_v2 = vmul.f32 0.25, %v617_v1  ;;  %v471_v16 = vsel %vm239_vm1, %v465_v10, -inf }
 0x44e   :  { %v631_v5 = vadd.f32 %v627_v2, %v234_v4 }
 0x44f   :  { %v454_v12 = vpop.f32.mrf.mxu3 }
 0x450   :  { %v637_v7 = vsel %vm239_vm1, %v631_v5, -inf  ;;  %v462_v15 = vmul.f32 0.25, %v454_v12 }
 0x451   :  { %638 = vmax.xlane.f32.xlu1 %v637_v7 }
 0x452   :  { %v466_v21 = vadd.f32 %v462_v15, %v235_v13 }
 0x453   :  { %v620_v8 = vpop.f32.mrf.mxu1 }
 0x454   :  { %v628_v9 = vmul.f32 0.25, %v620_v8  ;;  %v474_v25 = vsel %vm239_vm1, %v466_v21, -inf }
 0x456   :  { %v632_v14 = vadd.f32 %v628_v9, %v235_v13 }
 0x457   :  { %v457_v29 = vpop.f32.mrf.mxu3 }
 0x458   :  { %v640_v17 = vsel %vm239_vm1, %v632_v14, -inf  ;;  %v463_v30 = vmul.f32 0.25, %v457_v29 }
 0x459   :  { %472 = vmax.xlane.f32.xlu1 %v471_v16  ;;  %641 = vmax.xlane.f32.xlu2 %v640_v17 }
 0x45a   :  { %v2833_v31 = vadd.f32 %v463_v30, %v236_v22 }
 0x45b   :  { %v623_v18 = vpop.f32.mrf.mxu1 }
 0x45c   :  { %v629_v19 = vmul.f32 0.25, %v623_v18  ;;  %v477_v32 = vsel %vm239_vm1, %v2833_v31, -inf }
 0x45e   :  { %v2822_v24 = vadd.f32 %v629_v19, %v236_v22 }
 0x460   :  { %v643_v26 = vsel %vm239_vm1, %v2822_v24, -inf }
 0x461   :  { %475 = vmax.xlane.f32.xlu2 %v474_v25  ;;  %644 = vmax.xlane.f32.xlu0 %v643_v26 }
 0x472   :  { %2203 = vrot.lane.b32.xlu1 %v2202_v20, %s2412_s25 }
 0x479   :  { %2198 = vrot.lane.b32.xlu2 %v2197_v28, %s2412_s25 }
 0x49c   :  { %478 = vmax.xlane.f32.xlu1 %v477_v32 }
 0x4b5   :  { %2213 = vrot.lane.b32.xlu1 %v2202_v20, %s2407_s30 }
 0x4b8   :  { %v470_v33 = vpop.xlane.xlu0 %469 }
 0x4b9   :  { %v480_v36 = vsub.f32 %v464_v56, %v470_v33 }
 0x4bb   :  { %v484_v23 = vmul.f32 1.442695, %v480_v36 }
 0x4bc   :  { %v636_v34 = vpop.xlane.xlu2 %635 }
 0x4bd   :  { %v646_v35 = vsub.f32 %v630_v61, %v636_v34 }
 0x4bf   :  { %v650_v27 = vmul.f32 1.442695, %v646_v35 }
 0x4c1   :  { %2265 = vpow2.f32 %v650_v27 }
 0x4c2   :  { %2267 = vpow2.f32 %v484_v23 }
 0x4c4   :  { %v639_v37 = vpop.xlane.xlu1 %638 }
 0x4c5   :  { %v647_v39 = vsub.f32 %v631_v5, %v639_v37 }
 0x4c7   :  { %v2266_v38 = vpop.eup %2265  ;;  %v652_v41 = vmul.f32 1.442695, %v647_v39 }
 0x4c8   :  { %v658_v40 = vsel %vm239_vm1, %v2266_v38, 0.0  ;;  %v2839_v44 = vpop.eup %2267 }
 0x4c9   :  { %659 = vadd.xlane.f32.xlu0 %v658_v40  ;;  %2269 = vpow2.f32 %v652_v41  ;;  %v492_v48 = vsel %vm239_vm1, %v2839_v44, 0.0 }
 0x4cc   :  { %v642_v42 = vpop.xlane.xlu2 %641  ;;  %v473_v43 = vpop.xlane.xlu1 %472 }
 0x4cd   :  { %v648_v45 = vsub.f32 %v632_v14, %v642_v42  ;;  %v481_v46 = vsub.f32 %v465_v10, %v473_v43  ;;  %v401_v42 = vld [vmem:[%s3400_s9 + $0x18] sm:$0xff] }
 0x4ce   :  { %757 = vmatpush.msrb.mxu3 %v401_v42  ;;  %v932_v42 = vld [vmem:[%s3404_s13 + $0x18] sm:$0xff] }
 0x4cf   :  { %v654_v47 = vmul.f32 1.442695, %v648_v45  ;;  %v486_v49 = vmul.f32 1.442695, %v481_v46  ;;  %v2270_v51 = vpop.eup %2269  ;;  %961 = vmatpush.msrb.mxu1 %v932_v42 }
 0x4d0   :  { %v661_v57 = vsel %vm239_vm1, %v2270_v51, 0.0 }
 0x4d1   :  { %2271 = vpow2.f32 %v654_v47  ;;  %493 = vadd.xlane.f32.xlu0 %v492_v48 }
 0x4d2   :  { %2273 = vpow2.f32 %v486_v49  ;;  %v400_v49 = vld [vmem:[%s3400_s9 + $0x10] sm:$0xff] }
 0x4d3   :  { %758 = vmatpush.msrb.mxu3 %v400_v49 }
 0x4d4   :  { %v476_v50 = vpop.xlane.xlu2 %475  ;;  %v645_v7 = vpop.xlane.xlu0 %644 }
 0x4d5   :  { %v482_v52 = vsub.f32 %v466_v21, %v476_v50  ;;  %v649_v8 = vsub.f32 %v2822_v24, %v645_v7  ;;  %v399_v50 = vld [vmem:[%s3400_s9 + $0x8] sm:$0xff] }
 0x4d7   :  { %v2272_v53 = vpop.eup %2271  ;;  %v488_v54 = vmul.f32 1.442695, %v482_v52  ;;  %v656_v9 = vmul.f32 1.442695, %v649_v8 }
 0x4d8   :  { %v664_v56 = vsel %vm239_vm1, %v2272_v53, 0.0  ;;  %v2845_v58 = vpop.eup %2273 }
 0x4d9   :  { %2275 = vpow2.f32 %v488_v54  ;;  %665 = vadd.xlane.f32.xlu2 %v664_v56  ;;  %662 = vadd.xlane.f32.xlu0 %v661_v57  ;;  %v495_v63 = vsel %vm239_vm1, %v2845_v58, 0.0 }
 0x4da   :  { %2277 = vpow2.f32 %v656_v9 }
 0x4dc   :  { %v2199_v59 = vpop.permute.xlu2 %2198 }
 0x4dd   :  { %v2200_v61 = vunpack.i.l.bf16 %v2199_v59  ;;  %v2201_v1 = vunpack.i.h.bf16 %v2199_v59 }
 0x4df   :  { %v2849_v0 = vpop.eup %2275  ;;  %714 = vmatpush.msra.mxu2 %v2200_v61  ;;  %496 = vadd.xlane.f32.xlu1 %v495_v63 }
 0x4e0   :  { %v498_v2 = vsel %vm239_vm1, %v2849_v0, 0.0  ;;  %v2278_v14 = vpop.eup %2277 }
 0x4e1   :  { %499 = vadd.xlane.f32.xlu2 %v498_v2  ;;  %715 = vmatpush.msra.mxu2 %v2201_v1  ;;  %v667_v15 = vsel %vm239_vm1, %v2278_v14, 0.0  ;;  %v2240_v2 = vld [vmem:[%s3401_s10] ss:$0 sm:$0xff] }
 0x4e4   :  { %v2204_v4 = vpop.permute.xlu1 %2203 }
 0x4e5   :  { %v2205_v5 = vunpack.i.l.bf16 %v2204_v4  ;;  %v2206_v6 = vunpack.i.h.bf16 %v2204_v4 }
 0x4e7   :  { %716 = vmatpush.msra.mxu2 %v2205_v5 }
 0x4e9   :  { %717 = vmatpush.msra.mxu2 %v2206_v6 }
 0x4ed   :  { %2208 = vrot.lane.b32.xlu0 %v2197_v28, %s2407_s30 }
 0x50f   :  { %v479_v10 = vpop.xlane.xlu1 %478 }
 0x510   :  { %v483_v12 = vsub.f32 %v2833_v31, %v479_v10 }
 0x512   :  { %v490_v13 = vmul.f32 1.442695, %v483_v12 }
 0x514   :  { %2279 = vpow2.f32 %v490_v13 }
 0x517   :  { %668 = vadd.xlane.f32.xlu0 %v667_v15 }
 0x51a   :  { %v2280_v16 = vpop.eup %2279 }
 0x51b   :  { %v501_v17 = vsel %vm239_vm1, %v2280_v16, 0.0 }
 0x51c   :  { %502 = vadd.xlane.f32.xlu2 %v501_v17 }
 0x527   :  { %v2214_v29 = vpop.permute.xlu1 %2213 }
 0x528   :  { %v2215_v36 = vunpack.i.l.bf16 %v2214_v29  ;;  %v2216_v27 = vunpack.i.h.bf16 %v2214_v29 }
 0x53c   :  { %v660_v18 = vpop.xlane.xlu0 %659 }
 0x53d   :  { %2281 = vrcp.f32 %v660_v18 }
 0x543   :  { %v2282_v19 = vpop.eup %2281 }
 0x544   :  { %v674_v21 = vmul.f32 %v2282_v19, %v2266_v38  ;;  %v494_v22 = vpop.xlane.xlu0 %493 }
 0x546   :  { %2097 = vmatmul.msk.f32.vlgmr.msra.gmra.mxu2 %vm239_vm1, %v674_v21 }
 0x54c   :  { %v663_v24 = vpop.xlane.xlu0 %662  ;;  %v666_v25 = vpop.xlane.xlu2 %665 }
 0x54d   :  { %2283 = vrcp.f32 %v663_v24 }
 0x54e   :  { %2285 = vrcp.f32 %v666_v25 }
 0x54f   :  { %2287 = vrcp.f32 %v494_v22 }
 0x552   :  { %v497_v34 = vpop.xlane.xlu1 %496 }
 0x553   :  { %v2284_v26 = vpop.eup %2283  ;;  %2289 = vrcp.f32 %v497_v34 }
 0x554   :  { %v675_v20 = vmul.f32 %v2284_v26, %v2270_v51  ;;  %v2286_v28 = vpop.eup %2285  ;;  %v500_v37 = vpop.xlane.xlu2 %499  ;;  %v398_v51 = vld [vmem:[%s3400_s9] sm:$0xff] }
 0x555   :  { %v676_v30 = vmul.f32 %v2286_v28, %v2272_v53  ;;  %v2288_v35 = vpop.eup %2287  ;;  %2291 = vrcp.f32 %v500_v37 }
 0x556   :  { %2098 = vmatmul.msk.f32.gmra.mxu2 %vm239_vm1, %v675_v20  ;;  %v508_v23 = vmul.f32 %v2288_v35, %v2839_v44 }
 0x559   :  { %v2290_v38 = vpop.eup %2289 }
 0x55a   :  { %v509_v39 = vmul.f32 %v2290_v38, %v2845_v58 }
 0x55b   :  { %v2292_v40 = vpop.eup %2291 }
 0x55c   :  { %v510_v41 = vmul.f32 %v2292_v40, %v2849_v0 }
 0x55e   :  { %2099 = vmatmul.msk.f32.gmra.mxu2 %vm239_vm1, %v676_v30 }
 0x55f   :  { %v2209_v31 = vpop.permute.xlu0 %2208 }
 0x560   :  { %v2210_v32 = vunpack.i.l.bf16 %v2209_v31  ;;  %v2211_v33 = vunpack.i.h.bf16 %v2209_v31 }
 0x562   :  { %548 = vmatpush.msra.mxu0 %v2210_v32 }
 0x564   :  { %549 = vmatpush.msra.mxu0 %v2211_v33 }
 0x566   :  { %550 = vmatpush.msra.mxu0 %v2215_v36 }
 0x568   :  { %551 = vmatpush.msra.mxu0 %v2216_v27 }
 0x569   :  { %2085 = vmatmul.msk.f32.vlgmr.msra.gmra.mxu0 %vm239_vm1, %v508_v23 }
 0x56a   :  { %798 = vmatpush.msrb.mxu0 %v399_v50 }
 0x56c   :  { %799 = vmatpush.msrb.mxu0 %v398_v51 }
 0x571   :  { %2086 = vmatmul.msk.f32.gmra.mxu0 %vm239_vm1, %v509_v39 }
 0x579   :  { %2087 = vmatmul.msk.f32.gmra.mxu0 %vm239_vm1, %v510_v41 }
 0x58a   :  { %v669_v43 = vpop.xlane.xlu0 %668 }
 0x58b   :  { %2293 = vrcp.f32 %v669_v43  ;;  %v931_v43 = vld [vmem:[%s3404_s13 + $0x10] sm:$0xff] }
 0x58c   :  { %962 = vmatpush.msrb.mxu1 %v931_v43 }
 0x58f   :  { %v503_v44 = vpop.xlane.xlu2 %502 }
 0x590   :  { %2295 = vrcp.f32 %v503_v44  ;;  %v930_v44 = vld [vmem:[%s3404_s13 + $0x8] sm:$0xff] }
 0x591   :  { %v2294_v45 = vpop.eup %2293  ;;  %963 = vmatpush.msrb.mxu1 %v930_v44 }
 0x592   :  { %v677_v46 = vmul.f32 %v2294_v45, %v2278_v14  ;;  %v929_v45 = vld [vmem:[%s3404_s13] sm:$0xff] }
 0x593   :  { %964 = vmatpush.msrb.mxu1 %v929_v45  ;;  %v1026_v45 = vld [vmem:[%s3406_s15 + $0x60] sm:$0xff] }
 0x594   :  { %2100 = vmatmul.msk.f32.gmra.mxu2 %vm239_vm1, %v677_v46 }
 0x596   :  { %v2296_v47 = vpop.eup %2295 }
 0x597   :  { %v511_v48 = vmul.f32 %v2296_v47, %v2280_v16 }
 0x599   :  { %2088 = vmatmul.msk.f32.gmra.mxu0 %vm239_vm1, %v511_v48 }
 0x5c9   :  { %v719_v52 = vpop.f32.mrf.mxu2 }
 0x5ca   :  { %2101 = vmatmul.msk.f32.vlgmr.msrb.gmra.mxu3 %vm414_vm15, %v719_v52 }
 0x5d9   :  { %v722_v53 = vpop.f32.mrf.mxu2 }
 0x5da   :  { %2102 = vmatmul.msk.f32.gmra.mxu3 %vm414_vm15, %v722_v53 }
 0x5e1   :  { %v725_v54 = vpop.f32.mrf.mxu2 }
 0x5e2   :  { %2103 = vmatmul.msk.f32.gmra.mxu3 %vm414_vm15, %v725_v54 }
 0x5e6   :  { %v553_v56 = vpop.f32.mrf.mxu0 }
 0x5e7   :  { %2105 = vmatmul.msk.f32.vlgmr.msrb.gmra.mxu0 %vm414_vm15, %v553_v56 }
 0x5ee   :  { %v556_v57 = vpop.f32.mrf.mxu0 }
 0x5ef   :  { %2106 = vmatmul.msk.f32.gmra.mxu0 %vm414_vm15, %v556_v57 }
 0x5f6   :  { %v559_v58 = vpop.f32.mrf.mxu0 }
 0x5f7   :  { %2107 = vmatmul.msk.f32.gmra.mxu0 %vm414_vm15, %v559_v58 }
 0x616   :  { %v562_v59 = vpop.f32.mrf.mxu0 }
 0x617   :  { %v728_v61 = vpop.f32.mrf.mxu2  ;;  %2108 = vmatmul.msk.f32.gmra.mxu0 %vm414_vm15, %v562_v59 }
 0x618   :  { %2104 = vmatmul.msk.f32.gmra.mxu3 %vm414_vm15, %v728_v61 }
 0x64d   :  { %v760_v63 = vpop.f32.mrf.mxu3 }
 0x65d   :  { %v763_v6 = vpop.f32.mrf.mxu3 }
 0x664   :  { %v801_v0 = vpop.f32.mrf.mxu0 }
 0x665   :  { %v802_v1 = vadd.f32 %v801_v0, %v760_v63  ;;  %v766_v14 = vpop.f32.mrf.mxu3 }
 0x667   :  { %v813_v4 = vadd.f32 %v802_v1, %v2670_v55 }
 0x669   :  { %v2893_v5 = vadd.f32 %v2240_v2, %v813_v4 }
 0x66b   :  { %v827_v7 = vsel %vm239_vm1, %v2893_v5, 0.0 }
 0x66c   :  { %v804_v8 = vpop.f32.mrf.mxu0  ;;  %828 = vadd.xlane.f32.xlu1 %v827_v7 }
 0x66d   :  { %v805_v9 = vadd.f32 %v804_v8, %v763_v6  ;;  %v2242_v8 = vld [vmem:[%s3403_s12] ss:$0 sm:$0xff] }
 0x66f   :  { %v814_v10 = vadd.f32 %v805_v9, %v2680_v60 }
 0x671   :  { %v2898_v12 = vadd.f32 %v2240_v2, %v814_v10 }
 0x673   :  { %v830_v13 = vsel %vm239_vm1, %v2898_v12, 0.0 }
 0x674   :  { %v807_v15 = vpop.f32.mrf.mxu0  ;;  %831 = vadd.xlane.f32.xlu2 %v830_v13 }
 0x675   :  { %v808_v55 = vadd.f32 %v807_v15, %v766_v14 }
 0x677   :  { %v815_v16 = vadd.f32 %v808_v55, %v2691_v3 }
 0x679   :  { %v2903_v17 = vadd.f32 %v2240_v2, %v815_v16 }
 0x67b   :  { %v833_v18 = vsel %vm239_vm1, %v2903_v17, 0.0 }
 0x67c   :  { %834 = vadd.xlane.f32.xlu0 %v833_v18 }
 0x694   :  { %v810_v19 = vpop.f32.mrf.mxu0 }
 0x69b   :  { %v769_v21 = vpop.f32.mrf.mxu3 }
 0x69c   :  { %v811_v60 = vadd.f32 %v810_v19, %v769_v21 }
 0x69e   :  { %v816_v22 = vadd.f32 %v811_v60, %v2682_v62 }
 0x6a0   :  { %v2908_v24 = vadd.f32 %v2240_v2, %v816_v22  ;;  %v2241_v2 = vld [vmem:[%s3402_s11] ss:$0 sm:$0xff] }
 0x6a2   :  { %v836_v25 = vsel %vm239_vm1, %v2908_v24, 0.0 }
 0x6a3   :  { %837 = vadd.xlane.f32.xlu1 %v836_v25 }
 0x6df   :  { %v829_v26 = vpop.xlane.xlu1 %828 }
 0x6e0   :  { %v839_v3 = vmul.f32 %v829_v26, %v2695_v11 }
 0x6e2   :  { %v843_v20 = vsub.f32 %v2893_v5, %v839_v3 }
 0x6e4   :  { %v847_v28 = vmul.f32 %v843_v20, %v843_v20 }
 0x6e6   :  { %v851_v29 = vsel %vm239_vm1, %v847_v28, 0.0 }
 0x6e7   :  { %852 = vadd.xlane.f32.xlu2 %v851_v29  ;;  %v832_v30 = vpop.xlane.xlu2 %831 }
 0x6e8   :  { %v840_v31 = vmul.f32 %v832_v30, %v2695_v11 }
 0x6ea   :  { %v2917_v62 = vsub.f32 %v2898_v12, %v840_v31  ;;  %v1029_v31 = vld [vmem:[%s3406_s15 + $0x78] sm:$0xff] }
 0x6eb   :  { %1030 = vmatpush.msrb.mxu2 %v1029_v31 }
 0x6ec   :  { %v848_v32 = vmul.f32 %v2917_v62, %v2917_v62 }
 0x6ee   :  { %v854_v33 = vsel %vm239_vm1, %v848_v32, 0.0  ;;  %v1027_v32 = vld [vmem:[%s3406_s15 + $0x68] sm:$0xff] }
 0x6ef   :  { %855 = vadd.xlane.f32.xlu0 %v854_v33  ;;  %v835_v34 = vpop.xlane.xlu0 %834 }
 0x6f0   :  { %v841_v35 = vmul.f32 %v835_v34, %v2695_v11 }
 0x6f2   :  { %v2924_v36 = vsub.f32 %v2903_v17, %v841_v35 }
 0x6f4   :  { %v849_v27 = vmul.f32 %v2924_v36, %v2924_v36 }
 0x6f6   :  { %v857_v23 = vsel %vm239_vm1, %v849_v27, 0.0 }
 0x6f7   :  { %858 = vadd.xlane.f32.xlu1 %v857_v23 }
 0x716   :  { %v838_v37 = vpop.xlane.xlu1 %837 }
 0x717   :  { %v842_v38 = vmul.f32 %v838_v37, %v2695_v11 }
 0x719   :  { %v2931_v39 = vsub.f32 %v2908_v24, %v842_v38 }
 0x71b   :  { %v850_v40 = vmul.f32 %v2931_v39, %v2931_v39 }
 0x71d   :  { %v860_v41 = vsel %vm239_vm1, %v850_v40, 0.0 }
 0x71e   :  { %861 = vadd.xlane.f32.xlu2 %v860_v41 }
 0x75a   :  { %v853_v46 = vpop.xlane.xlu2 %852 }
 0x75b   :  { %v863_v47 = vmul.f32 %v853_v46, %v2695_v11  ;;  %v1025_v46 = vld [vmem:[%s3406_s15 + $0x58] sm:$0xff] }
 0x75d   :  { %v867_v48 = vadd.f32 1e-12, %v863_v47  ;;  %v1024_v47 = vld [vmem:[%s3406_s15 + $0x50] sm:$0xff] }
 0x75f   :  { %2297 = vrsqrt.f32 %v867_v48  ;;  %vm877_vm3 = vweird.f32 %v867_v48 }
 0x762   :  { %v856_v49 = vpop.xlane.xlu0 %855 }
 0x763   :  { %v864_v50 = vmul.f32 %v856_v49, %v2695_v11  ;;  %v1021_v49 = vld [vmem:[%s3406_s15 + $0x38] sm:$0xff] }
 0x765   :  { %v2298_v51 = vpop.eup %2297  ;;  %v868_v52 = vadd.f32 1e-12, %v864_v50  ;;  %v1020_v50 = vld [vmem:[%s3406_s15 + $0x30] sm:$0xff] }
 0x766   :  { %v872_v53 = vmul.f32 %v2298_v51, %v867_v48  ;;  %vm878_vm2 = vweird.f32 %v2298_v51  ;;  %v1022_v48 = vld [vmem:[%s3406_s15 + $0x40] sm:$0xff] }
 0x767   :  { %2299 = vrsqrt.f32 %v868_v52  ;;  %vm879_vm4 = vmor %vm877_vm3, %vm878_vm2  ;;  %vm887_vm6 = vweird.f32 %v868_v52 }
 0x768   :  { %v873_v54 = vmul.f32 %v2298_v51, %v872_v53  ;;  %v1017_v53 = vld [vmem:[%s3406_s15 + $0x18] sm:$0xff] }
 0x76a   :  { %v874_v56 = vmul.f32 0.5, %v873_v54  ;;  %v859_v57 = vpop.xlane.xlu1 %858  ;;  %v1016_v54 = vld [vmem:[%s3406_s15 + $0x10] sm:$0xff] }
 0x76b   :  { %v865_v58 = vmul.f32 %v859_v57, %v2695_v11  ;;  %v1014_v57 = vld [vmem:[%s3406_s15] sm:$0xff] }
 0x76c   :  { %v875_v59 = vsub.f32 1.5, %v874_v56  ;;  %v1015_v56 = vld [vmem:[%s3406_s15 + $0x8] sm:$0xff] }
 0x76d   :  { %v2300_v61 = vpop.eup %2299  ;;  %v869_v63 = vadd.f32 1e-12, %v865_v58  ;;  %v2243_v58 = vld [vmem:[%s3405_s14] ss:$0 sm:$0xff] }
 0x76e   :  { %v876_v0 = vmul.f32 %v2298_v51, %v875_v59  ;;  %v882_v1 = vmul.f32 %v2300_v61, %v868_v52  ;;  %vm888_vm5 = vweird.f32 %v2300_v61  ;;  %v1018_v52 = vld [vmem:[%s3406_s15 + $0x20] sm:$0xff] }
 0x76f   :  { %2301 = vrsqrt.f32 %v869_v63  ;;  %vm889_vm7 = vmor %vm887_vm6, %vm888_vm5  ;;  %vm897_vm9 = vweird.f32 %v869_v63 }
 0x770   :  { %v880_v4 = vsel %vm879_vm4, %v2298_v51, %v876_v0  ;;  %v883_v6 = vmul.f32 %v2300_v61, %v882_v1  ;;  %v1019_v51 = vld [vmem:[%s3406_s15 + $0x28] sm:$0xff] }
 0x771   :  { %v911_v7 = vmul.f32 %v880_v4, %v843_v20 }
 0x772   :  { %v884_v9 = vmul.f32 0.5, %v883_v6 }
 0x773   :  { %v918_v10 = vmul.f32 %v2241_v2, %v911_v7 }
 0x774   :  { %v885_v13 = vsub.f32 1.5, %v884_v9 }
 0x775   :  { %v2302_v14 = vpop.eup %2301  ;;  %v925_v15 = vadd.f32 %v2242_v8, %v918_v10 }
 0x776   :  { %v886_v55 = vmul.f32 %v2300_v61, %v885_v13  ;;  %v892_v16 = vmul.f32 %v2302_v14, %v869_v63  ;;  %vm898_vm8 = vweird.f32 %v2302_v14 }
 0x777   :  { %2109 = vmatmul.msk.f32.vlgmr.msrb.gmra.mxu1 %vm239_vm1, %v925_v15  ;;  %vm899_vm10 = vmor %vm897_vm9, %vm898_vm8 }
 0x778   :  { %v890_v18 = vsel %vm889_vm7, %v2300_v61, %v886_v55  ;;  %v893_v19 = vmul.f32 %v2302_v14, %v892_v16 }
 0x779   :  { %v912_v21 = vmul.f32 %v890_v18, %v2917_v62  ;;  %v1028_v62 = vld [vmem:[%s3406_s15 + $0x70] sm:$0xff] }
 0x77a   :  { %v894_v60 = vmul.f32 0.5, %v893_v19  ;;  %1031 = vmatpush.msrb.mxu2 %v1028_v62 }
 0x77b   :  { %v919_v22 = vmul.f32 %v2241_v2, %v912_v21 }
 0x77c   :  { %v895_v25 = vsub.f32 1.5, %v894_v60  ;;  %1032 = vmatpush.msrb.mxu2 %v1027_v32 }
 0x77d   :  { %v926_v26 = vadd.f32 %v2242_v8, %v919_v22 }
 0x77e   :  { %v896_v3 = vmul.f32 %v2302_v14, %v895_v25  ;;  %1033 = vmatpush.msrb.mxu2 %v1026_v45 }
 0x77f   :  { %2110 = vmatmul.msk.f32.gmra.mxu1 %vm239_vm1, %v926_v26 }
 0x780   :  { %v900_v20 = vsel %vm899_vm10, %v2302_v14, %v896_v3  ;;  %1034 = vmatpush.msrb.mxu2 %v1025_v46 }
 0x781   :  { %v913_v28 = vmul.f32 %v900_v20, %v2924_v36 }
 0x782   :  { %1035 = vmatpush.msrb.mxu2 %v1024_v47 }
 0x783   :  { %v920_v29 = vmul.f32 %v2241_v2, %v913_v28 }
 0x785   :  { %v927_v30 = vadd.f32 %v2242_v8, %v920_v29 }
 0x787   :  { %2111 = vmatmul.msk.f32.gmra.mxu1 %vm239_vm1, %v927_v30 }
 0x791   :  { %v862_v33 = vpop.xlane.xlu2 %861 }
 0x792   :  { %v866_v34 = vmul.f32 %v862_v33, %v2695_v11 }
 0x794   :  { %v870_v35 = vadd.f32 1e-12, %v866_v34 }
 0x796   :  { %2303 = vrsqrt.f32 %v870_v35  ;;  %vm907_vm12 = vweird.f32 %v870_v35 }
 0x79c   :  { %v2304_v36 = vpop.eup %2303 }
 0x79d   :  { %v902_v27 = vmul.f32 %v2304_v36, %v870_v35  ;;  %vm908_vm11 = vweird.f32 %v2304_v36 }
 0x79e   :  { %vm909_vm13 = vmor %vm907_vm12, %vm908_vm11 }
 0x79f   :  { %v903_v23 = vmul.f32 %v2304_v36, %v902_v27 }
 0x7a1   :  { %v904_v37 = vmul.f32 0.5, %v903_v23 }
 0x7a3   :  { %v905_v38 = vsub.f32 1.5, %v904_v37 }
 0x7a5   :  { %v906_v40 = vmul.f32 %v2304_v36, %v905_v38 }
 0x7a7   :  { %v910_v41 = vsel %vm909_vm13, %v2304_v36, %v906_v40 }
 0x7a8   :  { %v914_v42 = vmul.f32 %v910_v41, %v2931_v39  ;;  %v1023_v39 = vld [vmem:[%s3406_s15 + $0x48] sm:$0xff] }
 0x7a9   :  { %1036 = vmatpush.msrb.mxu2 %v1023_v39 }
 0x7aa   :  { %v921_v43 = vmul.f32 %v2241_v2, %v914_v42 }
 0x7ab   :  { %1037 = vmatpush.msrb.mxu2 %v1022_v48 }
 0x7ac   :  { %v928_v44 = vadd.f32 %v2242_v8, %v921_v43 }
 0x7ad   :  { %1038 = vmatpush.msrb.mxu2 %v1021_v49 }
 0x7ae   :  { %2112 = vmatmul.msk.f32.gmra.mxu1 %vm239_vm1, %v928_v44  ;;  %v2244_v44 = vld [vmem:[%s3407_s16] ss:$0 sm:$0xff] }
 0x7af   :  { %1039 = vmatpush.msrb.mxu2 %v1020_v50 }
 0x7b1   :  { %1040 = vmatpush.msrb.mxu2 %v1019_v51 }
 0x7b3   :  { %1041 = vmatpush.msrb.mxu2 %v1018_v52 }
 0x7b5   :  { %1042 = vmatpush.msrb.mxu2 %v1017_v53 }
 0x7b7   :  { %1043 = vmatpush.msrb.mxu2 %v1016_v54 }
 0x7b9   :  { %1044 = vmatpush.msrb.mxu2 %v1015_v56 }
 0x7bb   :  { %1045 = vmatpush.msrb.mxu2 %v1014_v57 }
 0x7f4   :  { %v966_v59 = vpop.f32.mrf.mxu1 }
 0x7f5   :  { %v967_v61 = vadd.f32 %v2243_v58, %v966_v59 }
 0x7f7   :  { %v978_v63 = vmul.f32 %v967_v61, %v967_v61 }
 0x7f9   :  { %v982_v0 = vmul.f32 %v978_v63, %v967_v61 }
 0x7fb   :  { %v986_v1 = vmul.f32 0.044715, %v982_v0 }
 0x7fc   :  { %v969_v2 = vpop.f32.mrf.mxu1 }
 0x7fd   :  { %v990_v4 = vadd.f32 %v986_v1, %v967_v61  ;;  %v970_v6 = vadd.f32 %v2243_v58, %v969_v2 }
 0x7ff   :  { %v994_v7 = vmul.f32 0.7978846, %v990_v4  ;;  %v979_v8 = vmul.f32 %v970_v6, %v970_v6 }
 0x801   :  { %2305 = vtanh.f32 %v994_v7  ;;  %v983_v9 = vmul.f32 %v979_v8, %v970_v6 }
 0x803   :  { %v987_v10 = vmul.f32 0.044715, %v983_v9 }
 0x804   :  { %v972_v13 = vpop.f32.mrf.mxu1 }
 0x805   :  { %v973_v14 = vadd.f32 %v2243_v58, %v972_v13  ;;  %v991_v15 = vadd.f32 %v987_v10, %v970_v6 }
 0x807   :  { %v2306_v55 = vpop.eup %2305  ;;  %v980_v16 = vmul.f32 %v973_v14, %v973_v14  ;;  %v995_v18 = vmul.f32 0.7978846, %v991_v15 }
 0x808   :  { %v1002_v19 = vadd.f32 1.0, %v2306_v55 }
 0x809   :  { %v984_v21 = vmul.f32 %v980_v16, %v973_v14  ;;  %2307 = vtanh.f32 %v995_v18 }
 0x80a   :  { %v1006_v60 = vmul.f32 0.5, %v1002_v19  ;;  %v2118_v19 = vld [vmem:[%s3398_s7 + $0x38] sm:$0xff] }
 0x80b   :  { %v988_v22 = vmul.f32 0.044715, %v984_v21  ;;  %1211 = vmatpush.msra.mxu3 %v2118_v19  ;;  %v2117_v21 = vld [vmem:[%s3398_s7 + $0x30] sm:$0xff] }
 0x80c   :  { %v1010_v25 = vmul.f32 %v1006_v60, %v967_v61  ;;  %v2116_v60 = vld [vmem:[%s3398_s7 + $0x28] sm:$0xff] }
 0x80d   :  { %v992_v26 = vadd.f32 %v988_v22, %v973_v14  ;;  %1212 = vmatpush.msra.mxu3 %v2117_v21  ;;  %v2115_v22 = vld [vmem:[%s3398_s7 + $0x20] sm:$0xff] }
 0x80e   :  { %1046 = vmatmul.f32.vlgmr.msrb.gmra.mxu2 %v1010_v25  ;;  %v2247_v21 = vld [vmem:[%s3399_s8 + $0x1] ss:$0 sm:$0xff] }
 0x80f   :  { %v2308_v3 = vpop.eup %2307  ;;  %v996_v20 = vmul.f32 0.7978846, %v992_v26  ;;  %1213 = vmatpush.msra.mxu3 %v2116_v60 }
 0x810   :  { %v1003_v28 = vadd.f32 1.0, %v2308_v3 }
 0x811   :  { %2309 = vtanh.f32 %v996_v20  ;;  %1214 = vmatpush.msra.mxu3 %v2115_v22 }
 0x812   :  { %v1007_v29 = vmul.f32 0.5, %v1003_v28 }
 0x814   :  { %v1011_v30 = vmul.f32 %v1007_v29, %v970_v6 }
 0x816   :  { %1049 = vmatmul.f32.gmra.mxu2 %v1011_v30 }
 0x817   :  { %v2310_v31 = vpop.eup %2309 }
 0x818   :  { %v1004_v62 = vadd.f32 1.0, %v2310_v31 }
 0x81a   :  { %v1008_v32 = vmul.f32 0.5, %v1004_v62 }
 0x81c   :  { %v1012_v33 = vmul.f32 %v1008_v32, %v973_v14 }
 0x81e   :  { %1052 = vmatmul.f32.gmra.mxu2 %v1012_v33 }
 0x82b   :  { %v975_v34 = vpop.f32.mrf.mxu1 }
 0x82c   :  { %v976_v35 = vadd.f32 %v2243_v58, %v975_v34 }
 0x82e   :  { %v981_v36 = vmul.f32 %v976_v35, %v976_v35 }
 0x830   :  { %v985_v27 = vmul.f32 %v981_v36, %v976_v35 }
 0x832   :  { %v989_v23 = vmul.f32 0.044715, %v985_v27 }
 0x834   :  { %v993_v37 = vadd.f32 %v989_v23, %v976_v35 }
 0x836   :  { %v997_v38 = vmul.f32 0.7978846, %v993_v37 }
 0x838   :  { %2311 = vtanh.f32 %v997_v38  ;;  %v2245_v38 = vld [vmem:[%s3396_s5 + $0x1] ss:$0 sm:$0xff] }
 0x83e   :  { %v2312_v40 = vpop.eup %2311 }
 0x83f   :  { %v1005_v41 = vadd.f32 1.0, %v2312_v40 }
 0x841   :  { %v1009_v42 = vmul.f32 0.5, %v1005_v41 }
 0x843   :  { %v1013_v43 = vmul.f32 %v1009_v42, %v976_v35 }
 0x845   :  { %1055 = vmatmul.f32.gmra.mxu2 %v1013_v43  ;;  %v2246_v43 = vld [vmem:[%s3397_s6 + $0x1] ss:$0 sm:$0xff] }
 0x891   :  { %v1047_v45 = vpop.f32.mrf.mxu2 }
 0x892   :  { %v1059_v46 = vadd.f32 %v1047_v45, %v2893_v5 }
 0x894   :  { %v3020_v47 = vadd.f32 %v2244_v44, %v1059_v46 }
 0x896   :  { %v1075_v39 = vsel %vm239_vm1, %v3020_v47, 0.0 }
 0x897   :  { %1076 = vadd.xlane.f32.xlu0 %v1075_v39 }
 0x899   :  { %v1050_v48 = vpop.f32.mrf.mxu2 }
 0x89a   :  { %v1060_v49 = vadd.f32 %v1050_v48, %v2898_v12 }
 0x89c   :  { %v3025_v50 = vadd.f32 %v2244_v44, %v1060_v49 }
 0x89e   :  { %v1078_v51 = vsel %vm239_vm1, %v3025_v50, 0.0 }
 0x89f   :  { %1079 = vadd.xlane.f32.xlu1 %v1078_v51 }
 0x8a1   :  { %v1053_v52 = vpop.f32.mrf.mxu2 }
 0x8a2   :  { %v1061_v53 = vadd.f32 %v1053_v52, %v2903_v17 }
 0x8a4   :  { %v3030_v54 = vadd.f32 %v2244_v44, %v1061_v53 }
 0x8a6   :  { %v1081_v5 = vsel %vm239_vm1, %v3030_v54, 0.0 }
 0x8a7   :  { %1082 = vadd.xlane.f32.xlu2 %v1081_v5 }
 0x8c8   :  { %v1056_v56 = vpop.f32.mrf.mxu2 }
 0x8c9   :  { %v1062_v57 = vadd.f32 %v1056_v56, %v2908_v24 }
 0x8cb   :  { %v3035_v58 = vadd.f32 %v2244_v44, %v1062_v57 }
 0x8cd   :  { %v1084_v12 = vsel %vm239_vm1, %v3035_v58, 0.0 }
 0x8ce   :  { %1085 = vadd.xlane.f32.xlu0 %v1084_v12 }
 0x90a   :  { %v1077_v59 = vpop.xlane.xlu0 %1076 }
 0x90b   :  { %v1087_v61 = vmul.f32 %v1077_v59, %v2695_v11 }
 0x90d   :  { %v1091_v17 = vsub.f32 %v3020_v47, %v1087_v61 }
 0x90f   :  { %v1095_v63 = vmul.f32 %v1091_v17, %v1091_v17 }
 0x911   :  { %v1099_v0 = vsel %vm239_vm1, %v1095_v63, 0.0 }
 0x912   :  { %1100 = vadd.xlane.f32.xlu1 %v1099_v0  ;;  %v1080_v1 = vpop.xlane.xlu1 %1079 }
 0x913   :  { %v1088_v2 = vmul.f32 %v1080_v1, %v2695_v11 }
 0x915   :  { %v3044_v24 = vsub.f32 %v3025_v50, %v1088_v2 }
 0x917   :  { %v1096_v4 = vmul.f32 %v3044_v24, %v3044_v24 }
 0x919   :  { %v1102_v6 = vsel %vm239_vm1, %v1096_v4, 0.0 }
 0x91a   :  { %v1083_v7 = vpop.xlane.xlu2 %1082  ;;  %1103 = vadd.xlane.f32.xlu2 %v1102_v6 }
 0x91b   :  { %v1089_v8 = vmul.f32 %v1083_v7, %v2695_v11 }
 0x91d   :  { %v3051_v9 = vsub.f32 %v3030_v54, %v1089_v8 }
 0x91f   :  { %v1097_v10 = vmul.f32 %v3051_v9, %v3051_v9 }
 0x921   :  { %v1105_v13 = vsel %vm239_vm1, %v1097_v10, 0.0 }
 0x922   :  { %1106 = vadd.xlane.f32.xlu0 %v1105_v13 }
 0x941   :  { %v1086_v14 = vpop.xlane.xlu0 %1085 }
 0x942   :  { %v1090_v15 = vmul.f32 %v1086_v14, %v2695_v11 }
 0x944   :  { %v3058_v55 = vsub.f32 %v3035_v58, %v1090_v15 }
 0x946   :  { %v1098_v16 = vmul.f32 %v3058_v55, %v3058_v55 }
 0x948   :  { %v1108_v18 = vsel %vm239_vm1, %v1098_v16, 0.0 }
 0x949   :  { %1109 = vadd.xlane.f32.xlu1 %v1108_v18 }
 0x985   :  { %v1101_v25 = vpop.xlane.xlu1 %1100 }
 0x986   :  { %v1111_v26 = vmul.f32 %v1101_v25, %v2695_v11 }
 0x988   :  { %v1115_v3 = vadd.f32 1e-12, %v1111_v26 }
 0x98a   :  { %2313 = vrsqrt.f32 %v1115_v3  ;;  %vm1125_vm2 = vweird.f32 %v1115_v3 }
 0x98d   :  { %v1104_v20 = vpop.xlane.xlu2 %1103 }
 0x98e   :  { %v1112_v28 = vmul.f32 %v1104_v20, %v2695_v11 }
 0x990   :  { %v2314_v29 = vpop.eup %2313  ;;  %v1116_v30 = vadd.f32 1e-12, %v1112_v28 }
 0x991   :  { %v1120_v31 = vmul.f32 %v2314_v29, %v1115_v3  ;;  %vm1126_vm14 = vweird.f32 %v2314_v29 }
 0x992   :  { %2315 = vrsqrt.f32 %v1116_v30  ;;  %vm1127_vm3 = vmor %vm1125_vm2, %vm1126_vm14  ;;  %vm1135_vm5 = vweird.f32 %v1116_v30 }
 0x993   :  { %v1121_v62 = vmul.f32 %v2314_v29, %v1120_v31 }
 0x995   :  { %v1122_v32 = vmul.f32 0.5, %v1121_v62  ;;  %v1107_v33 = vpop.xlane.xlu0 %1106 }
 0x996   :  { %v1113_v34 = vmul.f32 %v1107_v33, %v2695_v11 }
 0x997   :  { %v1123_v35 = vsub.f32 1.5, %v1122_v32 }
 0x998   :  { %v2316_v36 = vpop.eup %2315  ;;  %v1117_v27 = vadd.f32 1e-12, %v1113_v34 }
 0x999   :  { %v1124_v23 = vmul.f32 %v2314_v29, %v1123_v35  ;;  %v1130_v37 = vmul.f32 %v2316_v36, %v1116_v30  ;;  %vm1136_vm4 = vweird.f32 %v2316_v36 }
 0x99a   :  { %2317 = vrsqrt.f32 %v1117_v27  ;;  %vm1137_vm6 = vmor %vm1135_vm5, %vm1136_vm4  ;;  %vm1145_vm8 = vweird.f32 %v1117_v27 }
 0x99b   :  { %v1128_v40 = vsel %vm1127_vm3, %v2314_v29, %v1124_v23  ;;  %v1131_v41 = vmul.f32 %v2316_v36, %v1130_v37 }
 0x99c   :  { %v1159_v42 = vmul.f32 %v1128_v40, %v1091_v17 }
 0x99d   :  { %v1132_v44 = vmul.f32 0.5, %v1131_v41 }
 0x99e   :  { %v1166_v45 = vmul.f32 %v2245_v38, %v1159_v42 }
 0x99f   :  { %v1133_v46 = vsub.f32 1.5, %v1132_v44  ;;  %v2377_v44 = vld [vmem:[%s3395_s4] sm:$0xff] }
 0x9a0   :  { %v2318_v39 = vpop.eup %2317  ;;  %v1173_v48 = vadd.f32 %v2246_v43, %v1166_v45 }
 0x9a1   :  { %v1134_v49 = vmul.f32 %v2316_v36, %v1133_v46  ;;  %v1140_v51 = vmul.f32 %v2318_v39, %v1117_v27  ;;  %vm1146_vm7 = vweird.f32 %v2318_v39 }
 0x9a2   :  { %2120 = vmatmul.msk.f32.vlgmr.msra.gmra.mxu3 %vm239_vm1, %v1173_v48  ;;  %vm1147_vm9 = vmor %vm1145_vm8, %vm1146_vm7 }
 0x9a3   :  { %v1138_v52 = vsel %vm1137_vm6, %v2316_v36, %v1134_v49  ;;  %v1141_v53 = vmul.f32 %v2318_v39, %v1140_v51  ;;  %v2378_v49 = vld [vmem:[%s3395_s4 + $0x8] sm:$0xff] }
 0x9a4   :  { %v1160_v5 = vmul.f32 %v1138_v52, %v3044_v24 }
 0x9a5   :  { %v1142_v56 = vmul.f32 0.5, %v1141_v53 }
 0x9a6   :  { %v1167_v57 = vmul.f32 %v2245_v38, %v1160_v5 }
 0x9a7   :  { %v1143_v12 = vsub.f32 1.5, %v1142_v56  ;;  %v2379_v56 = vld [vmem:[%s3395_s4 + $0x10] sm:$0xff] }
 0x9a8   :  { %v1174_v59 = vadd.f32 %v2246_v43, %v1167_v57 }
 0x9a9   :  { %v1144_v61 = vmul.f32 %v2318_v39, %v1143_v12 }
 0x9aa   :  { %2121 = vmatmul.msk.f32.gmra.mxu3 %vm239_vm1, %v1174_v59 }
 0x9ab   :  { %v1148_v17 = vsel %vm1147_vm9, %v2318_v39, %v1144_v61 }
 0x9ac   :  { %v1161_v63 = vmul.f32 %v1148_v17, %v3051_v9 }
 0x9ae   :  { %v1168_v0 = vmul.f32 %v2245_v38, %v1161_v63 }
 0x9b0   :  { %v1175_v1 = vadd.f32 %v2246_v43, %v1168_v0 }
 0x9b2   :  { %2122 = vmatmul.msk.f32.gmra.mxu3 %vm239_vm1, %v1175_v1 }
 0x9bc   :  { %v1110_v2 = vpop.xlane.xlu1 %1109 }
 0x9bd   :  { %v1114_v24 = vmul.f32 %v1110_v2, %v2695_v11 }
 0x9bf   :  { %v1118_v4 = vadd.f32 1e-12, %v1114_v24 }
 0x9c1   :  { %2319 = vrsqrt.f32 %v1118_v4  ;;  %vm1155_vm11 = vweird.f32 %v1118_v4 }
 0x9c7   :  { %v2320_v6 = vpop.eup %2319 }
 0x9c8   :  { %v1150_v7 = vmul.f32 %v2320_v6, %v1118_v4  ;;  %vm1156_vm10 = vweird.f32 %v2320_v6 }
 0x9c9   :  { %vm1157_vm12 = vmor %vm1155_vm11, %vm1156_vm10 }
 0x9ca   :  { %v1151_v8 = vmul.f32 %v2320_v6, %v1150_v7 }
 0x9cc   :  { %v1152_v10 = vmul.f32 0.5, %v1151_v8 }
 0x9ce   :  { %v1153_v13 = vsub.f32 1.5, %v1152_v10  ;;  %v2380_v10 = vld [vmem:[%s3395_s4 + $0x18] sm:$0xff] }
 0x9d0   :  { %v1154_v14 = vmul.f32 %v2320_v6, %v1153_v13 }
 0x9d2   :  { %v1158_v15 = vsel %vm1157_vm12, %v2320_v6, %v1154_v14 }
 0x9d3   :  { %v1162_v9 = vmul.f32 %v1158_v15, %v3058_v55 }
 0x9d5   :  { %v1169_v16 = vmul.f32 %v2245_v38, %v1162_v9 }
 0x9d7   :  { %v1176_v18 = vadd.f32 %v2246_v43, %v1169_v16 }
 0x9d9   :  { %2123 = vmatmul.msk.f32.gmra.mxu3 %vm239_vm1, %v1176_v18 }
 0xa25   :  { %v1216_v19 = vpop.f32.mrf.mxu3 }
 0xa26   :  { %v3099_v26 = vadd.f32 %v2247_v21, %v1216_v19 }
 0xa2d   :  { %v1219_v60 = vpop.f32.mrf.mxu3 }
 0xa2e   :  { %v3095_v22 = vadd.f32 %v2247_v21, %v1219_v60 }
 0xa30   :  { %1405 = vrot.lane.b32.xlu1 %v3095_v22, %s2409_s28  ;;  %v2232_v60 = vpack.i.bf16 %v3099_v26, %v3095_v22 }
 0xa35   :  { %v1222_v25 = vpop.f32.mrf.mxu3 }
 0xa36   :  { %v1223_v3 = vadd.f32 %v2247_v21, %v1222_v25 }
 0xa38   :  { %1407 = vrot.lane.b32.xlu0 %v1223_v3, %s2409_s28  ;;  %1395 = vrot.lane.b32.xlu1 %v3099_v26, %s2411_s20 }
 0xa40   :  { %1397 = vrot.lane.b32.xlu1 %v3095_v22, %s2411_s20 }
 0xa5c   :  { %v1225_v55 = vpop.f32.mrf.mxu3 }
 0xa5d   :  { %v1226_v20 = vadd.f32 %v2247_v21, %v1225_v55 }
 0xa5f   :  { %1401 = vrot.lane.b32.xlu1 %v1226_v20, %s2411_s20  ;;  %1243 = vrot.lane.b32.xlu0 %v1226_v20, %s2410_s29  ;;  %v3117_v28 = vpack.i.bf16 %v1223_v3, %v1226_v20 }
 0xa60   :  { %1409 = vrot.lane.b32.xlu2 %v1226_v20, %s2409_s28 }
 0xa67   :  { %1241 = vrot.lane.b32.xlu0 %v1223_v3, %s2410_s29 }
 0xa68   :  { %1403 = vrot.lane.b32.xlu2 %v3099_v26, %s2409_s28 }
 0xa6f   :  { %1237 = vrot.lane.b32.xlu0 %v3099_v26, %s2410_s29 }
 0xa70   :  { %1239 = vrot.lane.b32.xlu2 %v3095_v22, %s2410_s29 }
 0xa78   :  { %1399 = vrot.lane.b32.xlu2 %v1223_v3, %s2411_s20 }
 0xa80   :  { %2218 = vrot.lane.b32.xlu2 %v3117_v28, %s2412_s25 }
 0xaa2   :  { %v1406_v30 = vpop.permute.xlu1 %1405 }
 0xaaa   :  { %v1408_v31 = vpop.permute.xlu0 %1407  ;;  %v1396_v32 = vpop.permute.xlu1 %1395 }
 0xab2   :  { %v1398_v34 = vpop.permute.xlu1 %1397 }
 0xaba   :  { %v1410_v29 = vpop.permute.xlu2 %1409 }
 0xabb   :  { %2140 = vmatpush.xpose.msk.msra.mxu2 %vm414_vm15, %v1410_v29 }
 0xabf   :  { %2141 = vmatpush.xpose.msk.msra.mxu2 %vm414_vm15, %v1408_v31 }
 0xac2   :  { %v1404_v62 = vpop.permute.xlu2 %1403 }
 0xac3   :  { %2142 = vmatpush.xpose.msk.msra.mxu2 %vm414_vm15, %v1406_v30 }
 0xac7   :  { %2143 = vmatpush.xpose.msk.msra.mxu2 %vm414_vm15, %v1404_v62 }
 0xaca   :  { %v1240_v33 = vpop.permute.xlu2 %1239  ;;  %2144 = vmatmul.msk.f32.vlgmr.msra.gmra.mxu2 %vm414_vm15, %v1396_v32 }
 0xad1   :  { %v1244_v35 = vpop.permute.xlu0 %1243  ;;  %v1402_v40 = vpop.permute.xlu1 %1401 }
 0xad2   :  { %v1400_v36 = vpop.permute.xlu2 %1399  ;;  %2145 = vmatmul.msk.f32.gmra.mxu2 %vm414_vm15, %v1398_v34  ;;  %2128 = vmatpush.xpose.msk.msra.mxu0 %vm414_vm15, %v1244_v35 }
 0xad9   :  { %v1242_v27 = vpop.permute.xlu0 %1241 }
 0xada   :  { %v2219_v23 = vpop.permute.xlu2 %2218  ;;  %2146 = vmatmul.msk.f32.gmra.mxu2 %vm414_vm15, %v1400_v36  ;;  %2129 = vmatpush.xpose.msk.msra.mxu0 %vm414_vm15, %v1242_v27 }
 0xadb   :  { %v2220_v37 = vunpack.i.l.bf16 %v2219_v23  ;;  %v2221_v38 = vunpack.i.h.bf16 %v2219_v23 }
 0xadd   :  { %1544 = vmatpush.msrb.mxu3 %v2220_v37 }
 0xade   :  { %2130 = vmatpush.xpose.msk.msra.mxu0 %vm414_vm15, %v1240_v33 }
 0xadf   :  { %1545 = vmatpush.msrb.mxu3 %v2221_v38 }
 0xae1   :  { %v1238_v41 = vpop.permute.xlu0 %1237 }
 0xae2   :  { %2147 = vmatmul.msk.f32.gmra.mxu2 %vm414_vm15, %v1402_v40  ;;  %2131 = vmatpush.xpose.msk.msra.mxu0 %vm414_vm15, %v1238_v41 }
 0xae5   :  { %2132 = vmatmul.msk.f32.vlgmr.msra.gmra.mxu0 %vm414_vm15, %v3099_v26 }
 0xaed   :  { %2133 = vmatmul.msk.f32.gmra.mxu0 %vm414_vm15, %v3095_v22 }
 0xaf5   :  { %2134 = vmatmul.msk.f32.gmra.mxu0 %vm414_vm15, %v1223_v3 }
 0xafd   :  { %2135 = vmatmul.msk.f32.gmra.mxu0 %vm414_vm15, %v1226_v20 }
 0xb4d   :  { %v1444_v42 = vpop.f32.mrf.mxu2 }
 0xb4e   :  { %v1456_v43 = vmul.f32 0.25, %v1444_v42 }
 0xb50   :  { %v1460_v45 = vadd.f32 %v2377_v44, %v1456_v43 }
 0xb52   :  { %v1464_v46 = vsel %vm239_vm1, %v1460_v45, -inf }
 0xb53   :  { %1465 = vmax.xlane.f32.xlu0 %v1464_v46 }
 0xb55   :  { %v1447_v39 = vpop.f32.mrf.mxu2 }
 0xb56   :  { %v1457_v48 = vmul.f32 0.25, %v1447_v39 }
 0xb58   :  { %v1461_v51 = vadd.f32 %v2378_v49, %v1457_v48 }
 0xb5a   :  { %v1467_v52 = vsel %vm239_vm1, %v1461_v51, -inf }
 0xb5b   :  { %1468 = vmax.xlane.f32.xlu1 %v1467_v52 }
 0xb5d   :  { %v1450_v53 = vpop.f32.mrf.mxu2 }
 0xb5e   :  { %v1458_v5 = vmul.f32 0.25, %v1450_v53 }
 0xb60   :  { %v1462_v57 = vadd.f32 %v2379_v56, %v1458_v5 }
 0xb62   :  { %v1278_v12 = vpop.f32.mrf.mxu0  ;;  %v1470_v59 = vsel %vm239_vm1, %v1462_v57, -inf }
 0xb63   :  { %v1290_v61 = vmul.f32 0.25, %v1278_v12  ;;  %1471 = vmax.xlane.f32.xlu0 %v1470_v59 }
 0xb65   :  { %v1294_v17 = vadd.f32 %v2377_v44, %v1290_v61  ;;  %v1453_v2 = vpop.f32.mrf.mxu2 }
 0xb66   :  { %v1459_v4 = vmul.f32 0.25, %v1453_v2 }
 0xb67   :  { %v1298_v63 = vsel %vm239_vm1, %v1294_v17, -inf }
 0xb68   :  { %1299 = vmax.xlane.f32.xlu2 %v1298_v63  ;;  %v1463_v13 = vadd.f32 %v2380_v10, %v1459_v4 }
 0xb6a   :  { %v1281_v0 = vpop.f32.mrf.mxu0  ;;  %v1473_v9 = vsel %vm239_vm1, %v1463_v13, -inf }
 0xb6b   :  { %v1291_v1 = vmul.f32 0.25, %v1281_v0 }
 0xb6d   :  { %v1295_v24 = vadd.f32 %v2378_v49, %v1291_v1 }
 0xb6f   :  { %v1301_v6 = vsel %vm239_vm1, %v1295_v24, -inf }
 0xb70   :  { %1302 = vmax.xlane.f32.xlu2 %v1301_v6 }
 0xb72   :  { %v1284_v7 = vpop.f32.mrf.mxu0 }
 0xb73   :  { %v1292_v8 = vmul.f32 0.25, %v1284_v7 }
 0xb75   :  { %v3156_v14 = vadd.f32 %v2379_v56, %v1292_v8 }
 0xb77   :  { %v1304_v15 = vsel %vm239_vm1, %v3156_v14, -inf }
 0xb78   :  { %1305 = vmax.xlane.f32.xlu1 %v1304_v15  ;;  %1474 = vmax.xlane.f32.xlu2 %v1473_v9 }
 0xb7a   :  { %v1287_v16 = vpop.f32.mrf.mxu0 }
 0xb7b   :  { %v1293_v18 = vmul.f32 0.25, %v1287_v16 }
 0xb7d   :  { %v1297_v19 = vadd.f32 %v2380_v10, %v1293_v18 }
 0xb7f   :  { %v1307_v21 = vsel %vm239_vm1, %v1297_v19, -inf }
 0xb80   :  { %1308 = vmax.xlane.f32.xlu0 %v1307_v21 }
 0xb90   :  { %2233 = vrot.lane.b32.xlu2 %v2232_v60, %s2407_s30 }
 0xbc6   :  { %v1466_v25 = vpop.xlane.xlu0 %1465 }
 0xbc7   :  { %v1476_v3 = vsub.f32 %v1460_v45, %v1466_v25 }
 0xbc9   :  { %v1480_v55 = vmul.f32 1.442695, %v1476_v3 }
 0xbcb   :  { %2321 = vpow2.f32 %v1480_v55 }
 0xbce   :  { %v1469_v32 = vpop.xlane.xlu1 %1468 }
 0xbcf   :  { %v1477_v22 = vsub.f32 %v1461_v51, %v1469_v32 }
 0xbd1   :  { %v3165_v20 = vpop.eup %2321  ;;  %v1482_v36 = vmul.f32 1.442695, %v1477_v22 }
 0xbd2   :  { %v1488_v29 = vsel %vm239_vm1, %v3165_v20, 0.0 }
 0xbd3   :  { %1489 = vadd.xlane.f32.xlu1 %v1488_v29 }
 0xbd6   :  { %v1472_v30 = vpop.xlane.xlu0 %1471 }
 0xbd7   :  { %v1478_v31 = vsub.f32 %v1462_v57, %v1472_v30 }
 0xbd9   :  { %v1484_v62 = vmul.f32 1.442695, %v1478_v31  ;;  %v2127_v31 = vld [vmem:[%s3400_s9 + $0x38] sm:$0xff] }
 0xbda   :  { %1587 = vmatpush.msrb.mxu0 %v2127_v31 }
 0xbdb   :  { %2323 = vpow2.f32 %v1484_v62  ;;  %v1300_v33 = vpop.xlane.xlu2 %1299 }
 0xbdc   :  { %v1310_v34 = vsub.f32 %v1294_v17, %v1300_v33 }
 0xbde   :  { %v1314_v26 = vmul.f32 1.442695, %v1310_v34 }
 0xbe0   :  { %2325 = vpow2.f32 %v1314_v26 }
 0xbe1   :  { %v2324_v35 = vpop.eup %2323  ;;  %2327 = vpow2.f32 %v1482_v36 }
 0xbe2   :  { %v1494_v27 = vsel %vm239_vm1, %v2324_v35, 0.0 }
 0xbe3   :  { %1495 = vadd.xlane.f32.xlu2 %v1494_v27  ;;  %v1303_v45 = vpop.xlane.xlu2 %1302  ;;  %v2126_v27 = vld [vmem:[%s3400_s9 + $0x30] sm:$0xff] }
 0xbe4   :  { %v1311_v39 = vsub.f32 %v1295_v24, %v1303_v45  ;;  %1588 = vmatpush.msrb.mxu0 %v2126_v27 }
 0xbe6   :  { %v3170_v23 = vpop.eup %2325  ;;  %v1316_v48 = vmul.f32 1.442695, %v1311_v39 }
 0xbe7   :  { %v1322_v37 = vsel %vm239_vm1, %v3170_v23, 0.0  ;;  %v2328_v38 = vpop.eup %2327 }
 0xbe8   :  { %1323 = vadd.xlane.f32.xlu0 %v1322_v37  ;;  %v1491_v40 = vsel %vm239_vm1, %v2328_v38, 0.0  ;;  %v2124_v37 = vld [vmem:[%s3400_s9 + $0x20] sm:$0xff] }
 0xbeb   :  { %v1475_v49 = vpop.xlane.xlu2 %1474  ;;  %v1306_v56 = vpop.xlane.xlu1 %1305 }
 0xbec   :  { %2223 = vrot.lane.b32.xlu1 %v2232_v60, %s2412_s25  ;;  %v1479_v51 = vsub.f32 %v1463_v13, %v1475_v49  ;;  %v1312_v12 = vsub.f32 %v3156_v14, %v1306_v56 }
 0xbee   :  { %v1486_v52 = vmul.f32 1.442695, %v1479_v51  ;;  %v1318_v61 = vmul.f32 1.442695, %v1312_v12  ;;  %v2248_v51 = vld [vmem:[%s3401_s10 + $0x1] ss:$0 sm:$0xff] }
 0xbf0   :  { %1492 = vadd.xlane.f32.xlu0 %v1491_v40 }
 0xbf3   :  { %v1309_v41 = vpop.xlane.xlu0 %1308  ;;  %v2234_v24 = vpop.permute.xlu2 %2233 }
 0xbf4   :  { %v1313_v42 = vsub.f32 %v1297_v19, %v1309_v41  ;;  %v2235_v60 = vunpack.i.l.bf16 %v2234_v24  ;;  %v2236_v25 = vunpack.i.h.bf16 %v2234_v24 }
 0xbf6   :  { %v1320_v43 = vmul.f32 1.442695, %v1313_v42 }
 0xbf8   :  { %2329 = vpow2.f32 %v1320_v43 }
 0xbf9   :  { %2331 = vpow2.f32 %v1316_v48 }
 0xbfa   :  { %2333 = vpow2.f32 %v1486_v52 }
 0xbfb   :  { %2335 = vpow2.f32 %v1318_v61 }
 0xbfe   :  { %v3176_v44 = vpop.eup %2329 }
 0xbff   :  { %v1331_v46 = vsel %vm239_vm1, %v3176_v44, 0.0  ;;  %v2332_v53 = vpop.eup %2331 }
 0xc00   :  { %1332 = vadd.xlane.f32.xlu2 %v1331_v46  ;;  %v1325_v5 = vsel %vm239_vm1, %v2332_v53, 0.0  ;;  %v2334_v57 = vpop.eup %2333 }
 0xc01   :  { %v1497_v59 = vsel %vm239_vm1, %v2334_v57, 0.0 }
 0xc04   :  { %2228 = vrot.lane.b32.xlu0 %v3117_v28, %s2407_s30  ;;  %v2336_v28 = vpop.eup %2335 }
 0xc05   :  { %v1328_v17 = vsel %vm239_vm1, %v2336_v28, 0.0 }
 0xc16   :  { %1326 = vadd.xlane.f32.xlu1 %v1325_v5 }
 0xc1e   :  { %1498 = vadd.xlane.f32.xlu1 %v1497_v59 }
 0xc2e   :  { %1329 = vadd.xlane.f32.xlu0 %v1328_v17 }
 0xc46   :  { %v1490_v63 = vpop.xlane.xlu1 %1489 }
 0xc47   :  { %2337 = vrcp.f32 %v1490_v63 }
 0xc4d   :  { %v2338_v2 = vpop.eup %2337 }
 0xc4e   :  { %v1504_v7 = vmul.f32 %v2338_v2, %v3165_v20 }
 0xc56   :  { %v1496_v10 = vpop.xlane.xlu2 %1495 }
 0xc5b   :  { %v1324_v0 = vpop.xlane.xlu0 %1323 }
 0xc5e   :  { %v2224_v1 = vpop.permute.xlu1 %2223 }
 0xc5f   :  { %v2225_v4 = vunpack.i.l.bf16 %v2224_v1  ;;  %v2226_v6 = vunpack.i.h.bf16 %v2224_v1 }
 0xc61   :  { %1546 = vmatpush.msrb.mxu3 %v2225_v4 }
 0xc63   :  { %1547 = vmatpush.msrb.mxu3 %v2226_v6  ;;  %v1493_v8 = vpop.xlane.xlu0 %1492 }
 0xc64   :  { %2339 = vrcp.f32 %v1493_v8  ;;  %2148 = vmatmul.msk.f32.vlgmr.msrb.gmra.mxu3 %vm239_vm1, %v1504_v7 }
 0xc65   :  { %2341 = vrcp.f32 %v1496_v10 }
 0xc66   :  { %2343 = vrcp.f32 %v1324_v0 }
 0xc6a   :  { %v2340_v13 = vpop.eup %2339 }
 0xc6b   :  { %v1505_v14 = vmul.f32 %v2340_v13, %v2328_v38  ;;  %v2342_v15 = vpop.eup %2341 }
 0xc6c   :  { %v1506_v9 = vmul.f32 %v2342_v15, %v2324_v35  ;;  %v2344_v21 = vpop.eup %2343 }
 0xc6d   :  { %2149 = vmatmul.msk.f32.gmra.mxu3 %vm239_vm1, %v1505_v14  ;;  %v1338_v3 = vmul.f32 %v2344_v21, %v3170_v23  ;;  %v2125_v23 = vld [vmem:[%s3400_s9 + $0x28] sm:$0xff] }
 0xc73   :  { %v1333_v34 = vpop.xlane.xlu2 %1332 }
 0xc75   :  { %2150 = vmatmul.msk.f32.gmra.mxu3 %vm239_vm1, %v1506_v9 }
 0xc76   :  { %v2229_v16 = vpop.permute.xlu0 %2228 }
 0xc77   :  { %v2230_v18 = vunpack.i.l.bf16 %v2229_v16  ;;  %v2231_v19 = vunpack.i.h.bf16 %v2229_v16 }
 0xc79   :  { %1378 = vmatpush.msra.mxu1 %v2230_v18 }
 0xc7b   :  { %1379 = vmatpush.msra.mxu1 %v2231_v19 }
 0xc7d   :  { %1380 = vmatpush.msra.mxu1 %v2235_v60 }
 0xc7f   :  { %1381 = vmatpush.msra.mxu1 %v2236_v25 }
 0xc80   :  { %2136 = vmatmul.msk.f32.vlgmr.msra.gmra.mxu1 %vm239_vm1, %v1338_v3 }
 0xc81   :  { %1628 = vmatpush.msrb.mxu1 %v2125_v23 }
 0xc83   :  { %1629 = vmatpush.msrb.mxu1 %v2124_v37 }
 0xc89   :  { %v1327_v55 = vpop.xlane.xlu1 %1326 }
 0xc8a   :  { %2345 = vrcp.f32 %v1327_v55 }
 0xc90   :  { %v2346_v20 = vpop.eup %2345 }
 0xc91   :  { %v1499_v29 = vpop.xlane.xlu1 %1498  ;;  %v1339_v30 = vmul.f32 %v2346_v20, %v2332_v53 }
 0xc92   :  { %2347 = vrcp.f32 %v1499_v29 }
 0xc93   :  { %2137 = vmatmul.msk.f32.gmra.mxu1 %vm239_vm1, %v1339_v30 }
 0xc98   :  { %v2348_v62 = vpop.eup %2347 }
 0xc99   :  { %v1507_v32 = vmul.f32 %v2348_v62, %v2334_v57 }
 0xc9b   :  { %2151 = vmatmul.msk.f32.gmra.mxu3 %vm239_vm1, %v1507_v32  ;;  %v2166_v32 = vld [vmem:[%s3404_s13 + $0x38] sm:$0xff] }
 0xc9c   :  { %1796 = vmatpush.msrb.mxu2 %v2166_v32 }
 0xca1   :  { %v1330_v33 = vpop.xlane.xlu0 %1329 }
 0xca2   :  { %2349 = vrcp.f32 %v1330_v33  ;;  %v2165_v33 = vld [vmem:[%s3404_s13 + $0x30] sm:$0xff] }
 0xca3   :  { %2351 = vrcp.f32 %v1333_v34  ;;  %1797 = vmatpush.msrb.mxu2 %v2165_v33  ;;  %v2164_v34 = vld [vmem:[%s3404_s13 + $0x28] sm:$0xff] }
 0xca5   :  { %1798 = vmatpush.msrb.mxu2 %v2164_v34 }
 0xca8   :  { %v2350_v22 = vpop.eup %2349 }
 0xca9   :  { %v1340_v26 = vmul.f32 %v2350_v22, %v2336_v28  ;;  %v2352_v35 = vpop.eup %2351  ;;  %v2163_v22 = vld [vmem:[%s3404_s13 + $0x20] sm:$0xff] }
 0xcaa   :  { %v1341_v36 = vmul.f32 %v2352_v35, %v3176_v44  ;;  %1799 = vmatpush.msrb.mxu2 %v2163_v22 }
 0xcab   :  { %2138 = vmatmul.msk.f32.gmra.mxu1 %vm239_vm1, %v1340_v26 }
 0xcb3   :  { %2139 = vmatmul.msk.f32.gmra.mxu1 %vm239_vm1, %v1341_v36 }
 0xce7   :  { %v1549_v38 = vpop.f32.mrf.mxu3 }
 0xce8   :  { %2152 = vmatmul.msk.f32.vlgmr.msrb.gmra.mxu0 %vm414_vm15, %v1549_v38 }
 0xcf0   :  { %v1552_v40 = vpop.f32.mrf.mxu3 }
 0xcf1   :  { %2153 = vmatmul.msk.f32.gmra.mxu0 %vm414_vm15, %v1552_v40 }
 0xcf8   :  { %v1555_v41 = vpop.f32.mrf.mxu3 }
 0xcf9   :  { %2154 = vmatmul.msk.f32.gmra.mxu0 %vm414_vm15, %v1555_v41 }
 0xcfd   :  { %v1383_v42 = vpop.f32.mrf.mxu1 }
 0xcfe   :  { %2156 = vmatmul.msk.f32.vlgmr.msrb.gmra.mxu1 %vm414_vm15, %v1383_v42 }
 0xd10   :  { %v1386_v43 = vpop.f32.mrf.mxu1 }
 0xd11   :  { %2157 = vmatmul.msk.f32.gmra.mxu1 %vm414_vm15, %v1386_v43 }
 0xd1e   :  { %v1558_v44 = vpop.f32.mrf.mxu3 }
 0xd1f   :  { %2155 = vmatmul.msk.f32.gmra.mxu0 %vm414_vm15, %v1558_v44  ;;  %v3277_v44 = vld [vmem:[%s3402_s11 + $0x1] ss:$0 sm:$0xff] }
 0xd28   :  { %v1389_v45 = vpop.f32.mrf.mxu1 }
 0xd29   :  { %2158 = vmatmul.msk.f32.gmra.mxu1 %vm414_vm15, %v1389_v45 }
 0xd30   :  { %v1392_v46 = vpop.f32.mrf.mxu1 }
 0xd31   :  { %2159 = vmatmul.msk.f32.gmra.mxu1 %vm414_vm15, %v1392_v46 }
 0xd65   :  { %v1590_v39 = vpop.f32.mrf.mxu0 }
 0xd6e   :  { %v1593_v56 = vpop.f32.mrf.mxu0 }
 0xd76   :  { %v1596_v17 = vpop.f32.mrf.mxu0 }
 0xd7b   :  { %v1631_v48 = vpop.f32.mrf.mxu1 }
 0xd7c   :  { %v1632_v49 = vadd.f32 %v1631_v48, %v1590_v39  ;;  %v2250_v48 = vld [vmem:[%s3403_s12 + $0x1] ss:$0 sm:$0xff] }
 0xd7e   :  { %v1643_v52 = vadd.f32 %v1632_v49, %v3020_v47 }
 0xd80   :  { %v3221_v53 = vadd.f32 %v2248_v51, %v1643_v52 }
 0xd82   :  { %v1660_v5 = vsel %vm239_vm1, %v3221_v53, 0.0 }
 0xd83   :  { %1661 = vadd.xlane.f32.xlu0 %v1660_v5 }
 0xd8e   :  { %v1634_v57 = vpop.f32.mrf.mxu1 }
 0xd8f   :  { %v1635_v12 = vadd.f32 %v1634_v57, %v1593_v56 }
 0xd91   :  { %v1644_v59 = vadd.f32 %v1635_v12, %v3025_v50 }
 0xd93   :  { %v3226_v61 = vadd.f32 %v2248_v51, %v1644_v59 }
 0xd95   :  { %v1663_v28 = vsel %vm239_vm1, %v3226_v61, 0.0 }
 0xd96   :  { %1664 = vadd.xlane.f32.xlu1 %v1663_v28 }
 0xd9c   :  { %v1599_v24 = vpop.f32.mrf.mxu0 }
 0xda6   :  { %v1637_v63 = vpop.f32.mrf.mxu1 }
 0xda7   :  { %v1638_v47 = vadd.f32 %v1637_v63, %v1596_v17 }
 0xda9   :  { %v1645_v0 = vadd.f32 %v1638_v47, %v3030_v54 }
 0xdab   :  { %v3231_v1 = vadd.f32 %v2248_v51, %v1645_v0 }
 0xdad   :  { %v1666_v2 = vsel %vm239_vm1, %v3231_v1, 0.0 }
 0xdae   :  { %v1640_v4 = vpop.f32.mrf.mxu1  ;;  %1667 = vadd.xlane.f32.xlu2 %v1666_v2 }
 0xdaf   :  { %v1641_v50 = vadd.f32 %v1640_v4, %v1599_v24  ;;  %v2187_v4 = vld [vmem:[%s3406_s15 + $0xf8] sm:$0xff] }
 0xdb0   :  { %1866 = vmatpush.msra.mxu3 %v2187_v4 }
 0xdb1   :  { %v1646_v6 = vadd.f32 %v1641_v50, %v3035_v58  ;;  %v2186_v50 = vld [vmem:[%s3406_s15 + $0xf0] sm:$0xff] }
 0xdb2   :  { %1867 = vmatpush.msra.mxu3 %v2186_v50 }
 0xdb3   :  { %v3236_v7 = vadd.f32 %v2248_v51, %v1646_v6  ;;  %v2185_v6 = vld [vmem:[%s3406_s15 + $0xe8] sm:$0xff] }
 0xdb4   :  { %1868 = vmatpush.msra.mxu3 %v2185_v6 }
 0xdb5   :  { %v1669_v8 = vsel %vm239_vm1, %v3236_v7, 0.0 }
 0xdb6   :  { %1670 = vadd.xlane.f32.xlu0 %v1669_v8 }
 0xdf6   :  { %v1662_v10 = vpop.xlane.xlu0 %1661 }
 0xdf7   :  { %v1672_v54 = vmul.f32 %v1662_v10, %v2695_v11 }
 0xdf9   :  { %v1676_v13 = vsub.f32 %v3221_v53, %v1672_v54 }
 0xdfb   :  { %v1680_v14 = vmul.f32 %v1676_v13, %v1676_v13 }
 0xdfd   :  { %v1684_v15 = vsel %vm239_vm1, %v1680_v14, 0.0 }
 0xdfe   :  { %1685 = vadd.xlane.f32.xlu1 %v1684_v15 }
 0xe09   :  { %v1665_v9 = vpop.xlane.xlu1 %1664 }
 0xe0a   :  { %v1673_v16 = vmul.f32 %v1665_v9, %v2695_v11 }
 0xe0c   :  { %v1677_v58 = vsub.f32 %v3226_v61, %v1673_v16 }
 0xe0e   :  { %v1681_v18 = vmul.f32 %v1677_v58, %v1677_v58 }
 0xe10   :  { %v1687_v19 = vsel %vm239_vm1, %v1681_v18, 0.0 }
 0xe11   :  { %1688 = vadd.xlane.f32.xlu2 %v1687_v19 }
 0xe21   :  { %v1668_v21 = vpop.xlane.xlu2 %1667 }
 0xe22   :  { %v1674_v60 = vmul.f32 %v1668_v21, %v2695_v11 }
 0xe24   :  { %v3248_v25 = vsub.f32 %v3231_v1, %v1674_v60 }
 0xe26   :  { %v1682_v3 = vmul.f32 %v3248_v25, %v3248_v25 }
 0xe28   :  { %v1690_v55 = vsel %vm239_vm1, %v1682_v3, 0.0 }
 0xe29   :  { %1691 = vadd.xlane.f32.xlu0 %v1690_v55  ;;  %v1671_v20 = vpop.xlane.xlu0 %1670 }
 0xe2a   :  { %v1675_v29 = vmul.f32 %v1671_v20, %v2695_v11 }
 0xe2c   :  { %v3255_v30 = vsub.f32 %v3236_v7, %v1675_v29 }
 0xe2e   :  { %v1683_v31 = vmul.f32 %v3255_v30, %v3255_v30 }
 0xe30   :  { %v1693_v62 = vsel %vm239_vm1, %v1683_v31, 0.0 }
 0xe31   :  { %1694 = vadd.xlane.f32.xlu1 %v1693_v62 }
 0xe71   :  { %v1686_v26 = vpop.xlane.xlu1 %1685 }
 0xe72   :  { %v1696_v35 = vmul.f32 %v1686_v26, %v2695_v11  ;;  %v2183_v26 = vld [vmem:[%s3406_s15 + $0xd8] sm:$0xff] }
 0xe74   :  { %v1700_v36 = vadd.f32 1e-12, %v1696_v35  ;;  %v2182_v35 = vld [vmem:[%s3406_s15 + $0xd0] sm:$0xff] }
 0xe76   :  { %2353 = vrsqrt.f32 %v1700_v36  ;;  %vm1710_vm13 = vweird.f32 %v1700_v36 }
 0xe7c   :  { %v2354_v27 = vpop.eup %2353 }
 0xe7d   :  { %v1705_v23 = vmul.f32 %v2354_v27, %v1700_v36  ;;  %vm1711_vm15 = vweird.f32 %v2354_v27  ;;  %v2180_v36 = vld [vmem:[%s3406_s15 + $0xc0] sm:$0xff] }
 0xe7e   :  { %vm1712_vm14 = vmor %vm1710_vm13, %vm1711_vm15 }
 0xe7f   :  { %v1706_v37 = vmul.f32 %v2354_v27, %v1705_v23  ;;  %v2178_v23 = vld [vmem:[%s3406_s15 + $0xb0] sm:$0xff] }
 0xe81   :  { %v1707_v38 = vmul.f32 0.5, %v1706_v37  ;;  %v2177_v37 = vld [vmem:[%s3406_s15 + $0xa8] sm:$0xff] }
 0xe83   :  { %v1708_v40 = vsub.f32 1.5, %v1707_v38  ;;  %v2176_v38 = vld [vmem:[%s3406_s15 + $0xa0] sm:$0xff] }
 0xe84   :  { %v1689_v41 = vpop.xlane.xlu2 %1688 }
 0xe85   :  { %v1709_v42 = vmul.f32 %v2354_v27, %v1708_v40  ;;  %v1697_v43 = vmul.f32 %v1689_v41, %v2695_v11  ;;  %v2175_v40 = vld [vmem:[%s3406_s15 + $0x98] sm:$0xff]  ;;  %v2174_v41 = vld [vmem:[%s3406_s15 + $0x90] sm:$0xff] }
 0xe87   :  { %v1713_v45 = vsel %vm1712_vm14, %v2354_v27, %v1709_v42  ;;  %v1701_v46 = vadd.f32 1e-12, %v1697_v43  ;;  %v2179_v27 = vld [vmem:[%s3406_s15 + $0xb8] sm:$0xff]  ;;  %v2173_v42 = vld [vmem:[%s3406_s15 + $0x88] sm:$0xff]  ;;  %v2172_v43 = vld [vmem:[%s3406_s15 + $0x80] sm:$0xff] }
 0xe88   :  { %v1744_v39 = vmul.f32 %v1713_v45, %v1676_v13 }
 0xe89   :  { %2355 = vrsqrt.f32 %v1701_v46  ;;  %vm1720_vm3 = vweird.f32 %v1701_v46 }
 0xe8a   :  { %v1751_v49 = vmul.f32 %v3277_v44, %v1744_v39 }
 0xe8c   :  { %v1758_v51 = vadd.f32 %v2250_v48, %v1751_v49 }
 0xe8e   :  { %2168 = vmatmul.msk.f32.vlgmr.msrb.gmra.mxu2 %vm239_vm1, %v1758_v51 }
 0xe8f   :  { %v2356_v52 = vpop.eup %2355 }
 0xe90   :  { %v1715_v5 = vmul.f32 %v2356_v52, %v1701_v46  ;;  %vm1721_vm2 = vweird.f32 %v2356_v52 }
 0xe91   :  { %vm1722_vm4 = vmor %vm1720_vm3, %vm1721_vm2 }
 0xe92   :  { %v1716_v56 = vmul.f32 %v2356_v52, %v1715_v5 }
 0xe94   :  { %v1717_v57 = vmul.f32 0.5, %v1716_v56 }
 0xe96   :  { %v1718_v12 = vsub.f32 1.5, %v1717_v57 }
 0xe98   :  { %v1719_v59 = vmul.f32 %v2356_v52, %v1718_v12 }
 0xe9a   :  { %v1723_v28 = vsel %vm1722_vm4, %v2356_v52, %v1719_v59 }
 0xe9b   :  { %v1745_v17 = vmul.f32 %v1723_v28, %v1677_v58 }
 0xe9c   :  { %v1692_v63 = vpop.xlane.xlu0 %1691 }
 0xe9d   :  { %v1698_v47 = vmul.f32 %v1692_v63, %v2695_v11  ;;  %v1752_v0 = vmul.f32 %v3277_v44, %v1745_v17 }
 0xe9f   :  { %v1702_v2 = vadd.f32 1e-12, %v1698_v47  ;;  %v1759_v24 = vadd.f32 %v2250_v48, %v1752_v0 }
 0xea1   :  { %2357 = vrsqrt.f32 %v1702_v2  ;;  %2169 = vmatmul.msk.f32.gmra.mxu2 %vm239_vm1, %v1759_v24  ;;  %vm1730_vm6 = vweird.f32 %v1702_v2 }
 0xea4   :  { %v1695_v8 = vpop.xlane.xlu1 %1694 }
 0xea5   :  { %v1699_v10 = vmul.f32 %v1695_v8, %v2695_v11 }
 0xea7   :  { %v2358_v54 = vpop.eup %2357  ;;  %v1703_v13 = vadd.f32 1e-12, %v1699_v10 }
 0xea8   :  { %v1725_v14 = vmul.f32 %v2358_v54, %v1702_v2  ;;  %vm1731_vm5 = vweird.f32 %v2358_v54 }
 0xea9   :  { %2359 = vrsqrt.f32 %v1703_v13  ;;  %vm1732_vm7 = vmor %vm1730_vm6, %vm1731_vm5  ;;  %vm1740_vm9 = vweird.f32 %v1703_v13 }
 0xeaa   :  { %v1726_v15 = vmul.f32 %v2358_v54, %v1725_v14 }
 0xeac   :  { %v1727_v9 = vmul.f32 0.5, %v1726_v15 }
 0xeae   :  { %v1728_v16 = vsub.f32 1.5, %v1727_v9 }
 0xeaf   :  { %v2360_v58 = vpop.eup %2359 }
 0xeb0   :  { %v1729_v18 = vmul.f32 %v2358_v54, %v1728_v16  ;;  %v1735_v19 = vmul.f32 %v2360_v58, %v1703_v13  ;;  %vm1741_vm8 = vweird.f32 %v2360_v58 }
 0xeb1   :  { %vm1742_vm10 = vmor %vm1740_vm9, %vm1741_vm8  ;;  %vm2026_vm9 = vcmask 785408  }
 0xeb2   :  { %v1733_v21 = vsel %vm1732_vm7, %v2358_v54, %v1729_v18  ;;  %v1736_v60 = vmul.f32 %v2360_v58, %v1735_v19 }
 0xeb3   :  { %v1746_v3 = vmul.f32 %v1733_v21, %v3248_v25  ;;  %v2184_v25 = vld [vmem:[%s3406_s15 + $0xe0] sm:$0xff] }
 0xeb4   :  { %v1737_v55 = vmul.f32 0.5, %v1736_v60  ;;  %1869 = vmatpush.msra.mxu3 %v2184_v25 }
 0xeb5   :  { %v1753_v20 = vmul.f32 %v3277_v44, %v1746_v3 }
 0xeb6   :  { %v1738_v29 = vsub.f32 1.5, %v1737_v55  ;;  %1870 = vmatpush.msra.mxu3 %v2183_v26 }
 0xeb7   :  { %v1760_v31 = vadd.f32 %v2250_v48, %v1753_v20 }
 0xeb8   :  { %v1739_v62 = vmul.f32 %v2360_v58, %v1738_v29  ;;  %1871 = vmatpush.msra.mxu3 %v2182_v35  ;;  %v2252_v35 = vld [vmem:[%s3407_s16 + $0x1] ss:$0 sm:$0xff] }
 0xeb9   :  { %2170 = vmatmul.msk.f32.gmra.mxu2 %vm239_vm1, %v1760_v31 }
 0xeba   :  { %v1743_v32 = vsel %vm1742_vm10, %v2360_v58, %v1739_v62 }
 0xebb   :  { %v1747_v33 = vmul.f32 %v1743_v32, %v3255_v30  ;;  %v2181_v30 = vld [vmem:[%s3406_s15 + $0xc8] sm:$0xff] }
 0xebc   :  { %1872 = vmatpush.msra.mxu3 %v2181_v30 }
 0xebd   :  { %v1754_v34 = vmul.f32 %v3277_v44, %v1747_v33  ;;  %v2251_v44 = vld [vmem:[%s3405_s14 + $0x1] ss:$0 sm:$0xff] }
 0xebe   :  { %1873 = vmatpush.msra.mxu3 %v2180_v36 }
 0xebf   :  { %v1761_v22 = vadd.f32 %v2250_v48, %v1754_v34 }
 0xec0   :  { %1874 = vmatpush.msra.mxu3 %v2179_v27 }
 0xec1   :  { %2171 = vmatmul.msk.f32.gmra.mxu2 %vm239_vm1, %v1761_v22 }
 0xec2   :  { %1875 = vmatpush.msra.mxu3 %v2178_v23 }
 0xec4   :  { %1876 = vmatpush.msra.mxu3 %v2177_v37 }
 0xec6   :  { %1877 = vmatpush.msra.mxu3 %v2176_v38 }
 0xec8   :  { %1878 = vmatpush.msra.mxu3 %v2175_v40 }
 0xeca   :  { %1879 = vmatpush.msra.mxu3 %v2174_v41 }
 0xecc   :  { %1880 = vmatpush.msra.mxu3 %v2173_v42 }
 0xece   :  { %1881 = vmatpush.msra.mxu3 %v2172_v43 }
 0xf11   :  { %v1801_v45 = vpop.f32.mrf.mxu2 }
 0xf12   :  { %v1802_v46 = vadd.f32 %v2251_v44, %v1801_v45 }
 0xf14   :  { %v1813_v39 = vmul.f32 %v1802_v46, %v1802_v46 }
 0xf16   :  { %v1817_v48 = vmul.f32 %v1813_v39, %v1802_v46 }
 0xf18   :  { %v1821_v49 = vmul.f32 0.044715, %v1817_v48 }
 0xf1a   :  { %v1825_v51 = vadd.f32 %v1821_v49, %v1802_v46 }
 0xf1c   :  { %v1829_v52 = vmul.f32 0.7978846, %v1825_v51 }
 0xf1e   :  { %2361 = vtanh.f32 %v1829_v52 }
 0xf24   :  { %v2362_v5 = vpop.eup %2361  ;;  %v1804_v56 = vpop.f32.mrf.mxu2 }
 0xf25   :  { %v1805_v57 = vadd.f32 %v2251_v44, %v1804_v56  ;;  %v1837_v12 = vadd.f32 1.0, %v2362_v5 }
 0xf27   :  { %v1814_v59 = vmul.f32 %v1805_v57, %v1805_v57  ;;  %v1841_v28 = vmul.f32 0.5, %v1837_v12 }
 0xf29   :  { %v1818_v17 = vmul.f32 %v1814_v59, %v1805_v57  ;;  %v1845_v63 = vmul.f32 %v1841_v28, %v1802_v46 }
 0xf2b   :  { %1882 = vmatmul.f32.vlgmr.msra.gmra.mxu3 %v1845_v63  ;;  %v1822_v47 = vmul.f32 0.044715, %v1818_v17 }
 0xf2d   :  { %v1826_v0 = vadd.f32 %v1822_v47, %v1805_v57 }
 0xf2f   :  { %v1830_v2 = vmul.f32 0.7978846, %v1826_v0 }
 0xf31   :  { %2363 = vtanh.f32 %v1830_v2 }
 0xf37   :  { %v2364_v24 = vpop.eup %2363 }
 0xf38   :  { %v1838_v4 = vadd.f32 1.0, %v2364_v24 }
 0xf3a   :  { %v1842_v50 = vmul.f32 0.5, %v1838_v4 }
 0xf3c   :  { %v1807_v6 = vpop.f32.mrf.mxu2  ;;  %v1846_v8 = vmul.f32 %v1842_v50, %v1805_v57 }
 0xf3d   :  { %v1808_v10 = vadd.f32 %v2251_v44, %v1807_v6 }
 0xf3e   :  { %1885 = vmatmul.f32.gmra.mxu3 %v1846_v8 }
 0xf3f   :  { %v1815_v54 = vmul.f32 %v1808_v10, %v1808_v10 }
 0xf41   :  { %v1819_v13 = vmul.f32 %v1815_v54, %v1808_v10 }
 0xf43   :  { %v1823_v14 = vmul.f32 0.044715, %v1819_v13 }
 0xf44   :  { %v1810_v15 = vpop.f32.mrf.mxu2 }
 0xf45   :  { %v1811_v9 = vadd.f32 %v2251_v44, %v1810_v15  ;;  %v1827_v16 = vadd.f32 %v1823_v14, %v1808_v10 }
 0xf47   :  { %v1816_v58 = vmul.f32 %v1811_v9, %v1811_v9  ;;  %v1831_v18 = vmul.f32 0.7978846, %v1827_v16 }
 0xf49   :  { %v1820_v19 = vmul.f32 %v1816_v58, %v1811_v9  ;;  %2365 = vtanh.f32 %v1831_v18 }
 0xf4b   :  { %v1824_v21 = vmul.f32 0.044715, %v1820_v19  ;;  %v2253_v19 = vld [vmem:[%s3408_s17] ss:$0 sm:$0xff]  ;;  %s2413_s17 = smov 32  }
 0xf4d   :  { %v1828_v60 = vadd.f32 %v1824_v21, %v1811_v9 }
 0xf4f   :  { %v2366_v3 = vpop.eup %2365  ;;  %v1832_v55 = vmul.f32 0.7978846, %v1828_v60 }
 0xf50   :  { %v1839_v20 = vadd.f32 1.0, %v2366_v3 }
 0xf51   :  { %2367 = vtanh.f32 %v1832_v55  ;;  %v2254_v55 = vld [vmem:[%s3409_s18] ss:$0 sm:$0xff]  ;;  %s2414_s18 = smov [#allocation2]  }
 0xf52   :  { %v1843_v29 = vmul.f32 0.5, %v1839_v20  ;;  %s2034_s28 = sshll.u32 %s2414_s18, 4  ;;  %s2035_s28 = int_to_ptr.vmem [resolvable:$true] %s2034_s28 }
 0xf54   :  { %v1847_v31 = vmul.f32 %v1843_v29, %v1808_v10 }
 0xf56   :  { %1888 = vmatmul.f32.gmra.mxu3 %v1847_v31 }
 0xf57   :  { %v2368_v62 = vpop.eup %2367 }
 0xf58   :  { %v1840_v32 = vadd.f32 1.0, %v2368_v62 }
 0xf5a   :  { %v1844_v33 = vmul.f32 0.5, %v1840_v32 }
 0xf5c   :  { %v1848_v34 = vmul.f32 %v1844_v33, %v1811_v9 }
 0xf5e   :  { %1891 = vmatmul.f32.gmra.mxu3 %v1848_v34 }
 0xfae   :  { %v1883_v22 = vpop.f32.mrf.mxu3 }
 0xfaf   :  { %v1895_v36 = vadd.f32 %v1883_v22, %v3221_v53 }
 0xfb1   :  { %v1904_v23 = vadd.f32 %v2252_v35, %v1895_v36 }
 0xfb3   :  { %v1910_v37 = vsel %vm239_vm1, %v1904_v23, 0.0 }
 0xfc1   :  { %v1886_v25 = vpop.f32.mrf.mxu3 }
 0xfc2   :  { %v1896_v26 = vadd.f32 %v1886_v25, %v3226_v61 }
 0xfc4   :  { %v1905_v30 = vadd.f32 %v2252_v35, %v1896_v26 }
 0xfc6   :  { %v1913_v27 = vsel %vm239_vm1, %v1905_v30, 0.0 }
 0xfc7   :  { %1914 = vadd.xlane.f32.xlu2 %v1913_v27 }
 0xfcf   :  { %1911 = vadd.xlane.f32.xlu2 %v1910_v37 }
 0xfd9   :  { %v1889_v38 = vpop.f32.mrf.mxu3 }
 0xfda   :  { %v1897_v40 = vadd.f32 %v1889_v38, %v3231_v1 }
 0xfdc   :  { %v1906_v41 = vadd.f32 %v2252_v35, %v1897_v40 }
 0xfde   :  { %v1916_v61 = vsel %vm239_vm1, %v1906_v41, 0.0 }
 0xfdf   :  { %1917 = vadd.xlane.f32.xlu0 %v1916_v61 }
 0xfe1   :  { %v1892_v42 = vpop.f32.mrf.mxu3 }
 0xfe2   :  { %v1898_v43 = vadd.f32 %v1892_v42, %v3236_v7 }
 0xfe4   :  { %v1907_v44 = vadd.f32 %v2252_v35, %v1898_v43 }
 0xfe6   :  { %v1919_v53 = vsel %vm239_vm1, %v1907_v44, 0.0 }
 0xfe7   :  { %1920 = vadd.xlane.f32.xlu1 %v1919_v53 }
0x103a   :  { %v1915_v45 = vpop.xlane.xlu2 %1914 }
0x103b   :  { %v1923_v46 = vmul.f32 %v1915_v45, %v2695_v11 }
0x103d   :  { %v1927_v39 = vsub.f32 %v1905_v30, %v1923_v46 }
0x103f   :  { %v1931_v48 = vmul.f32 %v1927_v39, %v1927_v39 }
0x1041   :  { %v1937_v49 = vsel %vm239_vm1, %v1931_v48, 0.0 }
0x1042   :  { %v1912_v51 = vpop.xlane.xlu2 %1911  ;;  %1938 = vadd.xlane.f32.xlu0 %v1937_v49 }
0x1043   :  { %v1922_v1 = vmul.f32 %v1912_v51, %v2695_v11 }
0x1045   :  { %v1926_v52 = vsub.f32 %v1904_v23, %v1922_v1 }
0x1047   :  { %v1930_v5 = vmul.f32 %v1926_v52, %v1926_v52 }
0x1049   :  { %v1934_v56 = vsel %vm239_vm1, %v1930_v5, 0.0 }
0x104a   :  { %1935 = vadd.xlane.f32.xlu0 %v1934_v56 }
0x1052   :  { %v1918_v7 = vpop.xlane.xlu0 %1917 }
0x1053   :  { %v1924_v57 = vmul.f32 %v1918_v7, %v2695_v11 }
0x1055   :  { %v3361_v12 = vsub.f32 %v1906_v41, %v1924_v57 }
0x1057   :  { %v1932_v59 = vmul.f32 %v3361_v12, %v3361_v12 }
0x1059   :  { %v1940_v28 = vsel %vm239_vm1, %v1932_v59, 0.0 }
0x105a   :  { %1941 = vadd.xlane.f32.xlu1 %v1940_v28  ;;  %v1921_v17 = vpop.xlane.xlu1 %1920 }
0x105b   :  { %v1925_v63 = vmul.f32 %v1921_v17, %v2695_v11 }
0x105d   :  { %v3367_v47 = vsub.f32 %v1907_v44, %v1925_v63 }
0x105f   :  { %v1933_v0 = vmul.f32 %v3367_v47, %v3367_v47 }
0x1061   :  { %v1943_v2 = vsel %vm239_vm1, %v1933_v0, 0.0 }
0x1062   :  { %1944 = vadd.xlane.f32.xlu2 %v1943_v2 }
0x10b5   :  { %v1939_v24 = vpop.xlane.xlu0 %1938 }
0x10b6   :  { %v1947_v4 = vmul.f32 %v1939_v24, %v2695_v11 }
0x10b8   :  { %v1951_v50 = vadd.f32 1e-12, %v1947_v4 }
0x10ba   :  { %2369 = vrsqrt.f32 %v1951_v50  ;;  %vm1970_vm12 = vweird.f32 %v1951_v50 }
0x10bd   :  { %v1936_v6 = vpop.xlane.xlu0 %1935 }
0x10be   :  { %v1946_v8 = vmul.f32 %v1936_v6, %v2695_v11 }
0x10c0   :  { %v2370_v10 = vpop.eup %2369  ;;  %v1950_v54 = vadd.f32 1e-12, %v1946_v8 }
0x10c1   :  { %v1965_v13 = vmul.f32 %v2370_v10, %v1951_v50  ;;  %vm1971_vm11 = vweird.f32 %v2370_v10 }
0x10c2   :  { %2371 = vrsqrt.f32 %v1950_v54  ;;  %vm1972_vm15 = vmor %vm1970_vm12, %vm1971_vm11  ;;  %vm1960_vm14 = vweird.f32 %v1950_v54 }
0x10c3   :  { %v1966_v14 = vmul.f32 %v2370_v10, %v1965_v13 }
0x10c5   :  { %v1967_v15 = vmul.f32 0.5, %v1966_v14 }
0x10c7   :  { %v1968_v9 = vsub.f32 1.5, %v1967_v15 }
0x10c8   :  { %v2372_v16 = vpop.eup %2371 }
0x10c9   :  { %v1969_v58 = vmul.f32 %v2370_v10, %v1968_v9  ;;  %v1955_v18 = vmul.f32 %v2372_v16, %v1950_v54  ;;  %vm1961_vm13 = vweird.f32 %v2372_v16 }
0x10ca   :  { %vm1962_vm2 = vmor %vm1960_vm14, %vm1961_vm13 }
0x10cb   :  { %v1973_v21 = vsel %vm1972_vm15, %v2370_v10, %v1969_v58  ;;  %v1956_v60 = vmul.f32 %v2372_v16, %v1955_v18 }
0x10cc   :  { %v1995_v3 = vmul.f32 %v1973_v21, %v1927_v39 }
0x10cd   :  { %v1957_v20 = vmul.f32 0.5, %v1956_v60  ;;  %v1942_v29 = vpop.xlane.xlu1 %1941 }
0x10ce   :  { %v1948_v31 = vmul.f32 %v1942_v29, %v2695_v11  ;;  %v2002_v62 = vmul.f32 %v2253_v19, %v1995_v3 }
0x10cf   :  { %v1958_v32 = vsub.f32 1.5, %v1957_v20 }
0x10d0   :  { %v1952_v33 = vadd.f32 1e-12, %v1948_v31  ;;  %v2009_v34 = vadd.f32 %v2254_v55, %v2002_v62 }
0x10d1   :  { %v1959_v22 = vmul.f32 %v2372_v16, %v1958_v32 }
0x10d2   :  { %2373 = vrsqrt.f32 %v1952_v33  ;;  %2013 = vrot.lane.b32.xlu1 %v2009_v34, %s2413_s17  ;;  %vm1980_vm4 = vweird.f32 %v1952_v33 }
0x10d3   :  { %v1963_v25 = vsel %vm1962_vm2, %v2372_v16, %v1959_v22 }
0x10d4   :  { %v1994_v26 = vmul.f32 %v1963_v25, %v1926_v52 }
0x10d5   :  { %v1945_v35 = vpop.xlane.xlu2 %1944 }
0x10d6   :  { %v1949_v30 = vmul.f32 %v1945_v35, %v2695_v11  ;;  %v2001_v36 = vmul.f32 %v2253_v19, %v1994_v26 }
0x10d8   :  { %v2374_v27 = vpop.eup %2373  ;;  %v1953_v23 = vadd.f32 1e-12, %v1949_v30  ;;  %v2008_v37 = vadd.f32 %v2254_v55, %v2001_v36 }
0x10d9   :  { %v1975_v38 = vmul.f32 %v2374_v27, %v1952_v33  ;;  %vm1981_vm3 = vweird.f32 %v2374_v27 }
0x10da   :  { %2375 = vrsqrt.f32 %v1953_v23  ;;  %vm1982_vm5 = vmor %vm1980_vm4, %vm1981_vm3  ;;  %vm1990_vm7 = vweird.f32 %v1953_v23 }
0x10db   :  { %v1976_v40 = vmul.f32 %v2374_v27, %v1975_v38 }
0x10dd   :  { %v1977_v41 = vmul.f32 0.5, %v1976_v40 }
0x10df   :  { %v1978_v61 = vsub.f32 1.5, %v1977_v41 }
0x10e0   :  { %v2376_v42 = vpop.eup %2375 }
0x10e1   :  { %v1979_v43 = vmul.f32 %v2374_v27, %v1978_v61  ;;  %v1985_v44 = vmul.f32 %v2376_v42, %v1953_v23  ;;  %vm1991_vm6 = vweird.f32 %v2376_v42 }
0x10e2   :  { %vm1992_vm8 = vmor %vm1990_vm7, %vm1991_vm6 }
0x10e3   :  { %v1983_v53 = vsel %vm1982_vm5, %v2374_v27, %v1979_v43  ;;  %v1986_v45 = vmul.f32 %v2376_v42, %v1985_v44 }
0x10e4   :  { %v1996_v46 = vmul.f32 %v1983_v53, %v3361_v12 }
0x10e5   :  { %v1987_v11 = vmul.f32 0.5, %v1986_v45 }
0x10e6   :  { %v2003_v39 = vmul.f32 %v2253_v19, %v1996_v46 }
0x10e7   :  { %v1988_v48 = vsub.f32 1.5, %v1987_v11 }
0x10e8   :  { %v2010_v49 = vadd.f32 %v2254_v55, %v2003_v39 }
0x10e9   :  { %v1989_v51 = vmul.f32 %v2376_v42, %v1988_v48 }
0x10ea   :  { %2017 = vrot.lane.b32.xlu2 %v2010_v49, %s2407_s30 }
0x10eb   :  { %v1993_v1 = vsel %vm1992_vm8, %v2376_v42, %v1989_v51 }
0x10ec   :  { %v1997_v52 = vmul.f32 %v1993_v1, %v3367_v47 }
0x10ee   :  { %v2004_v5 = vmul.f32 %v2253_v19, %v1997_v52 }
0x10f0   :  { %v2011_v56 = vadd.f32 %v2254_v55, %v2004_v5 }
0x10f2   :  { %2021 = vrot.lane.b32.xlu0 %v2011_v56, %s2410_s29 }
0x1144   :  { %v2014_v7 = vpop.permute.xlu1 %2013  ;;  %v2018_v12 = vpop.permute.xlu2 %2017 }
0x1145   :  { %v2024_v57 = vsel %vm239_vm1, %v2008_v37, %v2014_v7 }
0x1146   :  { %v2025_v59 = vsel %vm114_vm0, %v2024_v57, %v2018_v12 }
0x1164   :  { %v2022_v28 = vpop.permute.xlu0 %2021 }
0x1165   :  { %v2027_v17 = vsel %vm2026_vm9, %v2025_v59, %v2022_v28 }
0x1166   :  { %2028 = vst [vmem:[#allocation2] sm:$0xff] %v2027_v17 }
0x1167   :  { %2039 = dma.vmem_to_hbm [thread:$0]  %s2035_s28, 128, %s2037_s26, [#allocation3]  }
0x1168   :  { %2405 = dma.done.wait [#allocation3], 128  }
0x1169   :  { %2406 = vsyncadd [#allocation3], 4294967168 }
0x116a   :  { %2044 = vsyncpa [#allocation3], 1 }

</bundles_post_ra>
